<compile_context>
chip_gen: v5e
topology: v5e:2x2
jax: 0.10.0
libtpu: 0.0.40
codegen_flags: <defaults>
</compile_context>

<pallas_src>
import math

import jax
import jax.numpy as jnp
from jax.experimental import pallas as pl
from jax.experimental.pallas import tpu as pltpu


# ----------------------------------------------------------------------------
# Fused kernel.
# Grid = (row tiles over N [parallel], K tiles over N [arbitrary, reduction]).
#   u_ref = [Uz; Ur; Uh]  (3F, F),  v_ref = [Vz; Vr]  (2F, F)
# ----------------------------------------------------------------------------
def fused_evolvegcn_kernel(w_ref, u_ref, v_ref, vh_ref, bz_ref, br_ref, bh_ref,
                           x_ref, a_ref, wp_ref, bp_ref,
                           out_ref, h_ref,
                           acc_ref, wnew_ref):
    f32 = jnp.float32
    k = pl.program_id(1)

    @pl.when(k == 0)
    def _():
        # --- matrix-GRU weight evolution (tiny FxF, once per row tile / per core) ---
        W = w_ref[...]
        F = W.shape[0]
        uW = jnp.dot(u_ref[...], W, preferred_element_type=f32)   # (3F, F): one MXU pass
        vW = jnp.dot(v_ref[...], W, preferred_element_type=f32)   # (2F, F): one MXU pass
        z = jax.nn.sigmoid(uW[0:F] + vW[0:F] + bz_ref[...])
        r = jax.nn.sigmoid(uW[F:2 * F] + vW[F:2 * F] + br_ref[...])
        h_tilde = jnp.tanh(uW[2 * F:3 * F]
                           + jnp.dot(vh_ref[...], r * W, preferred_element_type=f32)
                           + bh_ref[...])
        wnew_ref[...] = ((1.0 - z) * W + z * h_tilde).astype(wnew_ref.dtype)
        acc_ref[...] = jnp.zeros_like(acc_ref)

    # --- XW K-slab computed on the fly (no XW HBM stream), then A-tile reduction ---
    xw = jnp.dot(x_ref[...], wnew_ref[...],
                 preferred_element_type=f32).astype(x_ref.dtype)        # (tk, fp) bf16
    acc_ref[...] += jnp.dot(a_ref[...], xw, preferred_element_type=f32)  # (tm, fp) f32

    @pl.when(k == pl.num_programs(1) - 1)
    def _():
        h = jnp.maximum(acc_ref[...], 0.0)                # relu
        h_ref[...] = h.astype(h_ref.dtype)                # bf16 writeback (half the stream)
        out_ref[...] = (jnp.dot(h.astype(wp_ref.dtype), wp_ref[...],
                                preferred_element_type=f32)
                        + bp_ref[...]).astype(out_ref.dtype)


# ----------------------------------------------------------------------------
# Wrapper
# ----------------------------------------------------------------------------
def _ru(x, m):
    return ((x + m - 1) // m) * m


def _pad2(a, rows, cols):
    return jnp.pad(a, ((0, rows - a.shape[0]), (0, cols - a.shape[1])))


def _pick_tile(npad, cap):
    """Largest tile in {512, 256, 128} that divides npad and is <= cap."""
    for t in (512, 256, 128):
        if t <= cap and npad % t == 0:
            return t
    return 128


def evolvegcn_forward(a_norm, x, params, *, tm=None, tk=None,
                      compute_dtype=jnp.bfloat16,
                      vmem_limit_bytes=48 * 1024 * 1024):
    """Fused forward pass.

    tm/tk: A row/column tile sizes (multiples of 128).  Defaults auto-pick up to 512
    as divisors of the 128-padded node count (no extra padding), keeping >= 2 row
    tiles when possible so both v7x TensorCores get work.  vmem_limit_bytes default
    (48 MiB) leaves headroom on v7x's 64 MiB; raise on v5e/v6e for even bigger tiles.
    """
    n, f = x.shape
    t = params["wp"].shape[1]
    fp = _ru(f, 128)                       # lane-dense feature dim
    tp = _ru(t, 128)                       # lane-dense target dim
    npad = _ru(n, 128)

    if tk is None:
        tk = _pick_tile(npad, min(512, npad))
    if tm is None:
        tm_cap = npad // 2 if npad >= 256 else npad   # prefer >=2 row tiles (megacore)
        tm = _pick_tile(npad, min(512, tm_cap))
    npad = _ru(npad, math.lcm(tm, tk))     # no-op for auto tiles; safety for explicit ones

    # ---- pad parameters (zeros -> valid region of every result is unchanged) ----
    w_p = _pad2(params["w"], fp, fp)
    u_stack = jnp.concatenate([_pad2(params["uz"], fp, fp),
                               _pad2(params["ur"], fp, fp),
                               _pad2(params["uh"], fp, fp)], axis=0)   # (3fp, fp)
    v_stack = jnp.concatenate([_pad2(params["vz"], fp, fp),
                               _pad2(params["vr"], fp, fp)], axis=0)   # (2fp, fp)
    vh_p = _pad2(params["vh"], fp, fp)
    bz_p = _pad2(params["bz"], 1, fp)
    br_p = _pad2(params["br"], 1, fp)
    bh_p = _pad2(params["bh"], 1, fp)
    wp_p = _pad2(params["wp"], fp, tp).astype(compute_dtype)  # bf16 readout weight
    bp_p = _pad2(params["bp"], 1, tp)

    x_p = _pad2(x, npad, fp).astype(compute_dtype)             # bf16 x stream
    a_p = _pad2(a_norm, npad, npad).astype(compute_dtype)      # bf16 halves the N^2 stream

    grid = (npad // tm, npad // tk)

    out_p, h_p = pl.pallas_call(
        fused_evolvegcn_kernel,
        out_shape=(jax.ShapeDtypeStruct((npad, tp), jnp.float32),
                   jax.ShapeDtypeStruct((npad, fp), compute_dtype)),
        grid_spec=pltpu.PrefetchScalarGridSpec(
            num_scalar_prefetch=0,
            grid=grid,
            in_specs=[
                pl.BlockSpec((fp, fp), lambda i, k: (0, 0)),      # W (prev GCN weight)
                pl.BlockSpec((3 * fp, fp), lambda i, k: (0, 0)),  # [Uz;Ur;Uh]
                pl.BlockSpec((2 * fp, fp), lambda i, k: (0, 0)),  # [Vz;Vr]
                pl.BlockSpec((fp, fp), lambda i, k: (0, 0)),      # Vh
                pl.BlockSpec((1, fp), lambda i, k: (0, 0)),       # bz
                pl.BlockSpec((1, fp), lambda i, k: (0, 0)),       # br
                pl.BlockSpec((1, fp), lambda i, k: (0, 0)),       # bh
                pl.BlockSpec((tk, fp), lambda i, k: (k, 0)),      # x K-slab (bf16)
                pl.BlockSpec((tm, tk), lambda i, k: (i, k)),      # A row/col tile (bf16)
                pl.BlockSpec((fp, tp), lambda i, k: (0, 0)),      # readout weight (bf16)
                pl.BlockSpec((1, tp), lambda i, k: (0, 0)),       # readout bias
            ],
            out_specs=(pl.BlockSpec((tm, tp), lambda i, k: (i, 0)),
                       pl.BlockSpec((tm, fp), lambda i, k: (i, 0))),
            scratch_shapes=[pltpu.VMEM((tm, fp), jnp.float32),    # f32 accumulator
                            pltpu.VMEM((fp, fp), compute_dtype)]),  # cached W_t (bf16)
        compiler_params=pltpu.CompilerParams(
            dimension_semantics=("parallel", "arbitrary"),
            vmem_limit_bytes=vmem_limit_bytes),
    )(w_p, u_stack, v_stack, vh_p, bz_p, br_p, bh_p, x_p, a_p, wp_p, bp_p)

    return out_p[:n, :t], h_p[:n, :f].astype(jnp.float32)


# ----------------------------------------------------------------------------
# Host-side glue (plain JAX) and parameter init
# ----------------------------------------------------------------------------
def normalized_adjacency(edge_index, num_nodes):
    """GCN-style sym-normalized dense adjacency with self loops (host glue)."""
    src, dst = edge_index[0], edge_index[1]
    a = jnp.zeros((num_nodes, num_nodes), jnp.float32)
    a = a.at[src, dst].add(1.0)                   # scatter-add duplicate edges (PyG-like)
    # TODO(synk): PyG gcn_norm uses add_remaining_self_loops; '+ eye' double-counts
    # self loops already present in edge_index and does not symmetrize directed lists.
    a = a + jnp.eye(num_nodes, dtype=jnp.float32)
    deg = a.sum(axis=1)
    dinv = jnp.where(deg > 0, 1.0 / jnp.sqrt(deg), 0.0)
    return dinv[:, None] * a * dinv[None, :]


def init_params(key, dim_node_features, dim_target):
    f, t = dim_node_features, dim_target
    keys = jax.random.split(key, 10)
    s_f = 1.0 / jnp.sqrt(jnp.float32(f))
    return {
        "w":  jax.random.normal(keys[0], (f, f), jnp.float32) * s_f,   # GCN weight
        "uz": jax.random.normal(keys[1], (f, f), jnp.float32) * s_f,   # GRU update gate
        "vz": jax.random.normal(keys[2], (f, f), jnp.float32) * s_f,
        "bz": jnp.zeros((1, f), jnp.float32),
        "ur": jax.random.normal(keys[3], (f, f), jnp.float32) * s_f,   # GRU reset gate
        "vr": jax.random.normal(keys[4], (f, f), jnp.float32) * s_f,
        "br": jnp.zeros((1, f), jnp.float32),
        "uh": jax.random.normal(keys[5], (f, f), jnp.float32) * s_f,   # GRU candidate
        "vh": jax.random.normal(keys[6], (f, f), jnp.float32) * s_f,
        "bh": jnp.zeros((1, f), jnp.float32),
        "wp": jax.random.normal(keys[7], (f, t), jnp.float32) * s_f,   # readout
        "bp": jnp.zeros((1, t), jnp.float32),
    }


def evolvegcn_reference(a_norm, x, params):
    """Pure-JAX reference for correctness checking."""
    W = params["w"]
    z = jax.nn.sigmoid(params["uz"] @ W + params["vz"] @ W + params["bz"])
    r = jax.nn.sigmoid(params["ur"] @ W + params["vr"] @ W + params["br"])
    h_tilde = jnp.tanh(params["uh"] @ W + params["vh"] @ (r * W) + params["bh"])
    w_new = (1.0 - z) * W + z * h_tilde
    h = jnp.maximum(a_norm @ (x @ w_new), 0.0)
    out = h @ params["wp"] + params["bp"]
    return out, h


if __name__ == "__main__":
    N = 16                 # nodes in the snapshot
    F = 32                 # dim_node_features
    T = 8                  # dim_target
    E = 40                 # number of edges

    key = jax.random.PRNGKey(0)
    k_x, k_e, k_p = jax.random.split(key, 3)

    x = jax.random.normal(k_x, (N, F), jnp.float32)                 # snapshot.x
    edge_index = jax.random.randint(k_e, (2, E), 0, N, jnp.int32)   # snapshot.edge_index
    params = init_params(k_p, F, T)

    a_norm = normalized_adjacency(edge_index, N)

    out, h = evolvegcn_forward(a_norm, x, params)
    out = jax.block_until_ready(out)
    h = jax.block_until_ready(h)

    out_ref, h_ref = evolvegcn_reference(a_norm, x, params)

    assert out.shape == (N, T) and h.shape == (N, F)
    assert bool(jnp.all(h >= 0.0))                       # relu applied
    assert bool(jnp.all(jnp.isfinite(out)))
    # bf16 on A / x / XW / h for the big matmul -> generous tolerance
    assert bool(jnp.allclose(h, h_ref, rtol=5e-2, atol=5e-2))
    assert bool(jnp.allclose(out, out_ref, rtol=5e-2, atol=5e-2))
    print("KERNEL_OK")
</pallas_src>

<mosaic_0001>
module attributes {stable_mosaic.version = 11 : i64} {
  func.func @fused_evolvegcn_kernel(%arg0: i32, %arg1: i32, %arg2: memref<128x128xf32, #tpu.memory_space<vmem>>, %arg3: memref<384x128xf32, #tpu.memory_space<vmem>>, %arg4: memref<256x128xf32, #tpu.memory_space<vmem>>, %arg5: memref<128x128xf32, #tpu.memory_space<vmem>>, %arg6: memref<1x128xf32, #tpu.memory_space<vmem>>, %arg7: memref<1x128xf32, #tpu.memory_space<vmem>>, %arg8: memref<1x128xf32, #tpu.memory_space<vmem>>, %arg9: memref<128x128xbf16, #tpu.memory_space<vmem>>, %arg10: memref<128x128xbf16, #tpu.memory_space<vmem>>, %arg11: memref<128x128xbf16, #tpu.memory_space<vmem>>, %arg12: memref<1x128xf32, #tpu.memory_space<vmem>>, %arg13: memref<128x128xf32, #tpu.memory_space<vmem>>, %arg14: memref<128x128xbf16, #tpu.memory_space<vmem>>, %arg15: memref<128x128xf32, #tpu.memory_space<vmem>>, %arg16: memref<128x128xbf16, #tpu.memory_space<vmem>>) attributes {dimension_semantics = [#tpu.dimension_semantics<parallel>, #tpu.dimension_semantics<arbitrary>], iteration_bounds = array<i64: 1, 1>, scalar_prefetch = 0 : i64, scratch_operands = 2 : i64, tpu.core_type = #tpu.core_type<tc>, window_params = [{pipeline_mode = #tpu.pipeline_mode<synchronous>, transform_indices = @transform_0, window_bounds = array<i64: 128, 128>}, {pipeline_mode = #tpu.pipeline_mode<synchronous>, transform_indices = @transform_1, window_bounds = array<i64: 384, 128>}, {pipeline_mode = #tpu.pipeline_mode<synchronous>, transform_indices = @transform_2, window_bounds = array<i64: 256, 128>}, {pipeline_mode = #tpu.pipeline_mode<synchronous>, transform_indices = @transform_3, window_bounds = array<i64: 128, 128>}, {pipeline_mode = #tpu.pipeline_mode<synchronous>, transform_indices = @transform_4, window_bounds = array<i64: 1, 128>}, {pipeline_mode = #tpu.pipeline_mode<synchronous>, transform_indices = @transform_5, window_bounds = array<i64: 1, 128>}, {pipeline_mode = #tpu.pipeline_mode<synchronous>, transform_indices = @transform_6, window_bounds = array<i64: 1, 128>}, {transform_indices = @transform_7, window_bounds = array<i64: 128, 128>}, {transform_indices = @transform_8, window_bounds = array<i64: 128, 128>}, {pipeline_mode = #tpu.pipeline_mode<synchronous>, transform_indices = @transform_9, window_bounds = array<i64: 128, 128>}, {pipeline_mode = #tpu.pipeline_mode<synchronous>, transform_indices = @transform_10, window_bounds = array<i64: 1, 128>}, {transform_indices = @transform_11, window_bounds = array<i64: 128, 128>}, {transform_indices = @transform_12, window_bounds = array<i64: 128, 128>}]} {
    %c0_i32 = arith.constant 0 : i32
    %0 = arith.cmpi eq, %arg1, %c0_i32 : i32
    %1 = arith.extui %0 : i1 to i32
    %c0_i32_0 = arith.constant 0 : i32
    %2 = arith.cmpi ne, %1, %c0_i32_0 : i32
    scf.if %2 {
      %c0_13 = arith.constant 0 : index
      %c0_14 = arith.constant 0 : index
      %15 = vector.load %arg2[%c0_13, %c0_14] : memref<128x128xf32, #tpu.memory_space<vmem>>, vector<128x128xf32>
      %c0_15 = arith.constant 0 : index
      %c0_16 = arith.constant 0 : index
      %16 = vector.load %arg3[%c0_15, %c0_16] : memref<384x128xf32, #tpu.memory_space<vmem>>, vector<384x128xf32>
      %cst_17 = arith.constant dense<0.000000e+00> : vector<384x128xf32>
      %17 = tpu.matmul %16, %15, %cst_17 {dimension_numbers = #tpu.dot_dimension_numbers<[1], [0], [0], [1], [0, 0, 1, 1], [], []>} : vector<384x128xf32>, vector<128x128xf32>, vector<384x128xf32> -> vector<384x128xf32>
      %c0_18 = arith.constant 0 : index
      %c0_19 = arith.constant 0 : index
      %18 = vector.load %arg4[%c0_18, %c0_19] : memref<256x128xf32, #tpu.memory_space<vmem>>, vector<256x128xf32>
      %cst_20 = arith.constant dense<0.000000e+00> : vector<256x128xf32>
      %19 = tpu.matmul %18, %15, %cst_20 {dimension_numbers = #tpu.dot_dimension_numbers<[1], [0], [0], [1], [0, 0, 1, 1], [], []>} : vector<256x128xf32>, vector<128x128xf32>, vector<256x128xf32> -> vector<256x128xf32>
      %20 = vector.extract_strided_slice %17 {offsets = [0, 0], sizes = [128, 128], strides = [1, 1]} : vector<384x128xf32> to vector<128x128xf32>
      %21 = vector.extract_strided_slice %19 {offsets = [0, 0], sizes = [128, 128], strides = [1, 1]} : vector<256x128xf32> to vector<128x128xf32>
      %22 = arith.addf %20, %21 : vector<128x128xf32>
      %c0_21 = arith.constant 0 : index
      %c0_22 = arith.constant 0 : index
      %23 = vector.load %arg6[%c0_21, %c0_22] : memref<1x128xf32, #tpu.memory_space<vmem>>, vector<1x128xf32>
      %24 = vector.broadcast %23 : vector<1x128xf32> to vector<128x128xf32>
      %25 = arith.addf %22, %24 : vector<128x128xf32>
      %26 = arith.negf %25 : vector<128x128xf32>
      %27 = math.exp %26 : vector<128x128xf32>
      %cst_23 = arith.constant 1.000000e+00 : f32
      %28 = vector.broadcast %cst_23 : f32 to vector<128x128xf32>
      %29 = arith.addf %28, %27 : vector<128x128xf32>
      %30 = arith.divf %28, %29 : vector<128x128xf32>
      %31 = vector.extract_strided_slice %17 {offsets = [128, 0], sizes = [128, 128], strides = [1, 1]} : vector<384x128xf32> to vector<128x128xf32>
      %32 = vector.extract_strided_slice %19 {offsets = [128, 0], sizes = [128, 128], strides = [1, 1]} : vector<256x128xf32> to vector<128x128xf32>
      %33 = arith.addf %31, %32 : vector<128x128xf32>
      %c0_24 = arith.constant 0 : index
      %c0_25 = arith.constant 0 : index
      %34 = vector.load %arg7[%c0_24, %c0_25] : memref<1x128xf32, #tpu.memory_space<vmem>>, vector<1x128xf32>
      %35 = vector.broadcast %34 : vector<1x128xf32> to vector<128x128xf32>
      %36 = arith.addf %33, %35 : vector<128x128xf32>
      %37 = arith.negf %36 : vector<128x128xf32>
      %38 = math.exp %37 : vector<128x128xf32>
      %cst_26 = arith.constant 1.000000e+00 : f32
      %39 = vector.broadcast %cst_26 : f32 to vector<128x128xf32>
      %40 = arith.addf %39, %38 : vector<128x128xf32>
      %41 = arith.divf %39, %40 : vector<128x128xf32>
      %42 = vector.extract_strided_slice %17 {offsets = [256, 0], sizes = [128, 128], strides = [1, 1]} : vector<384x128xf32> to vector<128x128xf32>
      %c0_27 = arith.constant 0 : index
      %c0_28 = arith.constant 0 : index
      %43 = vector.load %arg5[%c0_27, %c0_28] : memref<128x128xf32, #tpu.memory_space<vmem>>, vector<128x128xf32>
      %44 = arith.mulf %41, %15 : vector<128x128xf32>
      %cst_29 = arith.constant dense<0.000000e+00> : vector<128x128xf32>
      %45 = tpu.matmul %43, %44, %cst_29 {dimension_numbers = #tpu.dot_dimension_numbers<[1], [0], [0], [1], [0, 0, 1, 1], [], []>} : vector<128x128xf32>, vector<128x128xf32>, vector<128x128xf32> -> vector<128x128xf32>
      %46 = arith.addf %42, %45 : vector<128x128xf32>
      %c0_30 = arith.constant 0 : index
      %c0_31 = arith.constant 0 : index
      %47 = vector.load %arg8[%c0_30, %c0_31] : memref<1x128xf32, #tpu.memory_space<vmem>>, vector<1x128xf32>
      %48 = vector.broadcast %47 : vector<1x128xf32> to vector<128x128xf32>
      %49 = arith.addf %46, %48 : vector<128x128xf32>
      %50 = math.tanh %49 : vector<128x128xf32>
      %cst_32 = arith.constant 1.000000e+00 : f32
      %51 = vector.broadcast %cst_32 : f32 to vector<128x128xf32>
      %52 = arith.subf %51, %30 : vector<128x128xf32>
      %53 = arith.mulf %52, %15 : vector<128x128xf32>
      %54 = arith.mulf %30, %50 : vector<128x128xf32>
      %55 = arith.addf %53, %54 : vector<128x128xf32>
      %56 = arith.truncf %55 : vector<128x128xf32> to vector<128x128xbf16>
      %c0_33 = arith.constant 0 : index
      %c0_34 = arith.constant 0 : index
      %57 = vector.load %arg16[%c0_33, %c0_34] : memref<128x128xbf16, #tpu.memory_space<vmem>>, vector<128x128xbf16>
      tpu.vector_store %arg16[%c0_33, %c0_34], %56 {strides = array<i32>} : memref<128x128xbf16, #tpu.memory_space<vmem>>, vector<128x128xbf16>,
      %cst_35 = arith.constant 0.000000e+00 : f32
      %58 = vector.broadcast %cst_35 : f32 to vector<128x128xf32>
      %c0_36 = arith.constant 0 : index
      %c0_37 = arith.constant 0 : index
      %59 = vector.load %arg15[%c0_36, %c0_37] : memref<128x128xf32, #tpu.memory_space<vmem>>, vector<128x128xf32>
      tpu.vector_store %arg15[%c0_36, %c0_37], %58 {strides = array<i32>} : memref<128x128xf32, #tpu.memory_space<vmem>>, vector<128x128xf32>,
    } else {
    }
    %c0 = arith.constant 0 : index
    %c0_1 = arith.constant 0 : index
    %3 = vector.load %arg9[%c0, %c0_1] : memref<128x128xbf16, #tpu.memory_space<vmem>>, vector<128x128xbf16>
    %c0_2 = arith.constant 0 : index
    %c0_3 = arith.constant 0 : index
    %4 = vector.load %arg16[%c0_2, %c0_3] : memref<128x128xbf16, #tpu.memory_space<vmem>>, vector<128x128xbf16>
    %cst = arith.constant dense<0.000000e+00> : vector<128x128xf32>
    %5 = tpu.matmul %3, %4, %cst {dimension_numbers = #tpu.dot_dimension_numbers<[1], [0], [0], [1], [0, 0, 1, 1], [], []>} : vector<128x128xbf16>, vector<128x128xbf16>, vector<128x128xf32> -> vector<128x128xf32>
    %6 = arith.truncf %5 : vector<128x128xf32> to vector<128x128xbf16>
    %c0_4 = arith.constant 0 : index
    %c0_5 = arith.constant 0 : index
    %7 = vector.load %arg15[%c0_4, %c0_5] : memref<128x128xf32, #tpu.memory_space<vmem>>, vector<128x128xf32>
    %c0_6 = arith.constant 0 : index
    %c0_7 = arith.constant 0 : index
    %8 = vector.load %arg10[%c0_6, %c0_7] : memref<128x128xbf16, #tpu.memory_space<vmem>>, vector<128x128xbf16>
    %cst_8 = arith.constant dense<0.000000e+00> : vector<128x128xf32>
    %9 = tpu.matmul %8, %6, %cst_8 {dimension_numbers = #tpu.dot_dimension_numbers<[1], [0], [0], [1], [0, 0, 1, 1], [], []>} : vector<128x128xbf16>, vector<128x128xbf16>, vector<128x128xf32> -> vector<128x128xf32>
    %10 = arith.addf %7, %9 : vector<128x128xf32>
    %c0_9 = arith.constant 0 : index
    %c0_10 = arith.constant 0 : index
    %11 = vector.load %arg15[%c0_9, %c0_10] : memref<128x128xf32, #tpu.memory_space<vmem>>, vector<128x128xf32>
    tpu.vector_store %arg15[%c0_9, %c0_10], %10 {strides = array<i32>} : memref<128x128xf32, #tpu.memory_space<vmem>>, vector<128x128xf32>,
    %c0_i32_11 = arith.constant 0 : i32
    %12 = arith.cmpi eq, %arg1, %c0_i32_11 : i32
    %13 = arith.extui %12 : i1 to i32
    %c0_i32_12 = arith.constant 0 : i32
    %14 = arith.cmpi ne, %13, %c0_i32_12 : i32
    scf.if %14 {
      %c0_13 = arith.constant 0 : index
      %c0_14 = arith.constant 0 : index
      %15 = vector.load %arg15[%c0_13, %c0_14] : memref<128x128xf32, #tpu.memory_space<vmem>>, vector<128x128xf32>
      %cst_15 = arith.constant 0.000000e+00 : f32
      %16 = vector.broadcast %cst_15 : f32 to vector<128x128xf32>
      %17 = arith.maximumf %15, %16 : vector<128x128xf32>
      %18 = arith.truncf %17 : vector<128x128xf32> to vector<128x128xbf16>
      %c0_16 = arith.constant 0 : index
      %c0_17 = arith.constant 0 : index
      %19 = vector.load %arg14[%c0_16, %c0_17] : memref<128x128xbf16, #tpu.memory_space<vmem>>, vector<128x128xbf16>
      tpu.vector_store %arg14[%c0_16, %c0_17], %18 {strides = array<i32>} : memref<128x128xbf16, #tpu.memory_space<vmem>>, vector<128x128xbf16>,
      %20 = arith.truncf %17 : vector<128x128xf32> to vector<128x128xbf16>
      %c0_18 = arith.constant 0 : index
      %c0_19 = arith.constant 0 : index
      %21 = vector.load %arg11[%c0_18, %c0_19] : memref<128x128xbf16, #tpu.memory_space<vmem>>, vector<128x128xbf16>
      %cst_20 = arith.constant dense<0.000000e+00> : vector<128x128xf32>
      %22 = tpu.matmul %20, %21, %cst_20 {dimension_numbers = #tpu.dot_dimension_numbers<[1], [0], [0], [1], [0, 0, 1, 1], [], []>} : vector<128x128xbf16>, vector<128x128xbf16>, vector<128x128xf32> -> vector<128x128xf32>
      %c0_21 = arith.constant 0 : index
      %c0_22 = arith.constant 0 : index
      %23 = vector.load %arg12[%c0_21, %c0_22] : memref<1x128xf32, #tpu.memory_space<vmem>>, vector<1x128xf32>
      %24 = vector.broadcast %23 : vector<1x128xf32> to vector<128x128xf32>
      %25 = arith.addf %22, %24 : vector<128x128xf32>
      %c0_23 = arith.constant 0 : index
      %c0_24 = arith.constant 0 : index
      %26 = vector.load %arg13[%c0_23, %c0_24] : memref<128x128xf32, #tpu.memory_space<vmem>>, vector<128x128xf32>
      tpu.vector_store %arg13[%c0_23, %c0_24], %25 {strides = array<i32>} : memref<128x128xf32, #tpu.memory_space<vmem>>, vector<128x128xf32>,
    } else {
    }
    return
  }
  func.func @transform_0(%arg0: i32, %arg1: i32) -> (i32, i32) {
    %c0_i32 = arith.constant 0 : i32
    %c0_i32_0 = arith.constant 0 : i32
    %c0_i32_1 = arith.constant 0 : i32
    return %c0_i32, %c0_i32_0 : i32, i32
  }
  func.func @transform_1(%arg0: i32, %arg1: i32) -> (i32, i32) {
    %c0_i32 = arith.constant 0 : i32
    %c0_i32_0 = arith.constant 0 : i32
    %c0_i32_1 = arith.constant 0 : i32
    return %c0_i32, %c0_i32_0 : i32, i32
  }
  func.func @transform_2(%arg0: i32, %arg1: i32) -> (i32, i32) {
    %c0_i32 = arith.constant 0 : i32
    %c0_i32_0 = arith.constant 0 : i32
    %c0_i32_1 = arith.constant 0 : i32
    return %c0_i32, %c0_i32_0 : i32, i32
  }
  func.func @transform_3(%arg0: i32, %arg1: i32) -> (i32, i32) {
    %c0_i32 = arith.constant 0 : i32
    %c0_i32_0 = arith.constant 0 : i32
    %c0_i32_1 = arith.constant 0 : i32
    return %c0_i32, %c0_i32_0 : i32, i32
  }
  func.func @transform_4(%arg0: i32, %arg1: i32) -> (i32, i32) {
    %c0_i32 = arith.constant 0 : i32
    %c0_i32_0 = arith.constant 0 : i32
    %c0_i32_1 = arith.constant 0 : i32
    return %c0_i32, %c0_i32_0 : i32, i32
  }
  func.func @transform_5(%arg0: i32, %arg1: i32) -> (i32, i32) {
    %c0_i32 = arith.constant 0 : i32
    %c0_i32_0 = arith.constant 0 : i32
    %c0_i32_1 = arith.constant 0 : i32
    return %c0_i32, %c0_i32_0 : i32, i32
  }
  func.func @transform_6(%arg0: i32, %arg1: i32) -> (i32, i32) {
    %c0_i32 = arith.constant 0 : i32
    %c0_i32_0 = arith.constant 0 : i32
    %c0_i32_1 = arith.constant 0 : i32
    return %c0_i32, %c0_i32_0 : i32, i32
  }
  func.func @transform_7(%arg0: i32, %arg1: i32) -> (i32, i32) {
    %c0_i32 = arith.constant 0 : i32
    %c0_i32_0 = arith.constant 0 : i32
    return %arg1, %c0_i32 : i32, i32
  }
  func.func @transform_8(%arg0: i32, %arg1: i32) -> (i32, i32) {
    %c0_i32 = arith.constant 0 : i32
    return %arg0, %arg1 : i32, i32
  }
  func.func @transform_9(%arg0: i32, %arg1: i32) -> (i32, i32) {
    %c0_i32 = arith.constant 0 : i32
    %c0_i32_0 = arith.constant 0 : i32
    %c0_i32_1 = arith.constant 0 : i32
    return %c0_i32, %c0_i32_0 : i32, i32
  }
  func.func @transform_10(%arg0: i32, %arg1: i32) -> (i32, i32) {
    %c0_i32 = arith.constant 0 : i32
    %c0_i32_0 = arith.constant 0 : i32
    %c0_i32_1 = arith.constant 0 : i32
    return %c0_i32, %c0_i32_0 : i32, i32
  }
  func.func @transform_11(%arg0: i32, %arg1: i32) -> (i32, i32) {
    %c0_i32 = arith.constant 0 : i32
    %c0_i32_0 = arith.constant 0 : i32
    return %arg0, %c0_i32 : i32, i32
  }
  func.func @transform_12(%arg0: i32, %arg1: i32) -> (i32, i32) {
    %c0_i32 = arith.constant 0 : i32
    %c0_i32_0 = arith.constant 0 : i32
    return %arg0, %c0_i32 : i32, i32
  }
}

</mosaic_0001>

<bundles_post_ra>
// kernel: tpu_custom_call.1
= control target key start
LH: loop header
LB: loop body
LE: loop exit
PB: predicated region body
PF: predicated region fallthrough
CT: control target
= control target key end

     0   :  { %18 = vsyncpa [#allocation5], 0  ;;  %s3980_s0 = inlined_call_operand.hbm [shape: f32[128,128], index: 0, kind: input, shape index: {}]   ;;  %s3981_s1 = inlined_call_operand.hbm [shape: f32[384,128], index: 1, kind: input, shape index: {}]   ;;  %s3982_s2 = inlined_call_operand.hbm [shape: f32[256,128], index: 2, kind: input, shape index: {}]   ;;  %s3983_s3 = inlined_call_operand.hbm [shape: f32[128,128], index: 3, kind: input, shape index: {}]   ;;  %s3984_s4 = inlined_call_operand.vmem [shape: f32[1,128], index: 4, kind: input, shape index: {}]   ;;  %s3985_s5 = inlined_call_operand.vmem [shape: f32[1,128], index: 5, kind: input, shape index: {}]   ;;  %s3986_s6 = inlined_call_operand.vmem [shape: f32[1,128], index: 6, kind: input, shape index: {}]   ;;  %s3987_s7 = inlined_call_operand.hbm [shape: bf16[128,128], index: 7, kind: input, shape index: {}]   ;;  %s3988_s8 = inlined_call_operand.hbm [shape: bf16[128,128], index: 8, kind: input, shape index: {}]   ;;  %s3989_s9 = inlined_call_operand.hbm [shape: bf16[128,128], index: 9, kind: input, shape index: {}]   ;;  %s3990_s10 = inlined_call_operand.vmem [shape: f32[1,128], index: 10, kind: input, shape index: {}]   ;;  %s3991_s11 = inlined_call_operand.hbm [shape: f32[128,128], index: 11, kind: output, shape index: {0}]   ;;  %s3992_s12 = inlined_call_operand.hbm [shape: bf16[128,128], index: 12, kind: output, shape index: {1}]  }
   0x1   :  { %19 = vsyncpa [#allocation8], 0 }
   0x2   :  { %20 = vsyncpa [#allocation11], 0 }
   0x3   :  { %21 = vsyncpa [#allocation14], 0 }
   0x4   :  { %22 = vsyncpa [#allocation6], 0 }
   0x5   :  { %23 = vsyncpa [#allocation18], 0  ;;  %s41_s23 = sshll.u32 %s3981_s1, 4  ;;  %s2861_s24 = smov [#allocation7]   ;;  %s42_s23 = int_to_ptr.hbm [resolvable:$true] %s41_s23 }
   0x6   :  { %s43_s25 = sshll.u32 %s2861_s24, 4  ;;  %s67_s28 = sshll.u32 %s3983_s3, 4  ;;  %s44_s25 = int_to_ptr.vmem [resolvable:$true] %s43_s25  ;;  %s68_s28 = int_to_ptr.hbm [resolvable:$true] %s67_s28 }
   0x7   :  { %s2862_s29 = smov 128   ;;  %s2863_s30 = smov 8  }
   0x8   :  { %49 = dma.hbm_to_vmem [thread:$0]  %s42_s23, 6144, %s44_s25, [#allocation8], %s2862_s29, %s2862_s29, %s2863_s30  }
   0x9   :  { %s2864_s13 = smov [#allocation10]   ;;  %s99_s16 = sshll.u32 %s3988_s8, 4  ;;  %s100_s16 = int_to_ptr.hbm [resolvable:$true] %s99_s16 }
   0xa   :  { %s69_s14 = sshll.u32 %s2864_s13, 4  ;;  %s2865_s3 = smov [#allocation13]   ;;  %s70_s14 = int_to_ptr.vmem [resolvable:$true] %s69_s14 }
   0xb   :  { %75 = dma.hbm_to_vmem [thread:$0]  %s68_s28, 2048, %s70_s14, [#allocation11], %s2862_s29, %s2862_s29, %s2863_s30  }
   0xc   :  { %s101_s17 = sshll.u32 %s2865_s3, 4  ;;  %s28_s20 = sshll.u32 %s3980_s0, 4  ;;  %s102_s17 = int_to_ptr.vmem [resolvable:$true] %s101_s17  ;;  %s29_s20 = int_to_ptr.hbm [resolvable:$true] %s28_s20 }
   0xd   :  { %s2866_s21 = smov 64   ;;  %s2867_s22 = smov 4  }
   0xe   :  { %107 = dma.hbm_to_vmem [thread:$0]  %s100_s16, 1024, %s102_s17, [#allocation14], %s2866_s21, %s2866_s21, %s2867_s22  }
   0xf   :  { %s2868_s23 = smov [#allocation4]   ;;  %s54_s8 = sshll.u32 %s3982_s2, 4  ;;  %s55_s8 = int_to_ptr.hbm [resolvable:$true] %s54_s8 }
  0x10   :  { %s30_s24 = sshll.u32 %s2868_s23, 4  ;;  %s86_s28 = sshll.u32 %s3987_s7, 4  ;;  %s31_s24 = int_to_ptr.vmem [resolvable:$true] %s30_s24  ;;  %s87_s28 = int_to_ptr.hbm [resolvable:$true] %s86_s28 }
  0x11   :  { %36 = dma.hbm_to_vmem [thread:$0]  %s29_s20, 2048, %s31_s24, [#allocation5], %s2862_s29, %s2862_s29, %s2863_s30  }
  0x12   :  { %s2869_s13 = smov [#allocation9]   ;;  %s2870_s1 = smov [#allocation12]  }
  0x13   :  { %s56_s14 = sshll.u32 %s2869_s13, 4  ;;  %s88_s2 = sshll.u32 %s2870_s1, 4  ;;  %s57_s14 = int_to_ptr.vmem [resolvable:$true] %s56_s14  ;;  %s89_s2 = int_to_ptr.vmem [resolvable:$true] %s88_s2 }
  0x14   :  { %62 = dma.hbm_to_vmem [thread:$0]  %s55_s8, 4096, %s57_s14, [#allocation8], %s2862_s29, %s2862_s29, %s2863_s30  }
  0x15   :  { %s112_s3 = sshll.u32 %s3989_s9, 4  ;;  %s2871_s7 = smov [#allocation15]   ;;  %s113_s3 = int_to_ptr.hbm [resolvable:$true] %s112_s3 }
  0x16   :  { %94 = dma.hbm_to_vmem [thread:$0]  %s87_s28, 1024, %s89_s2, [#allocation11], %s2866_s21, %s2866_s21, %s2867_s22  }
  0x17   :  { %s114_s17 = sshll.u32 %s2871_s7, 4  ;;  %s115_s17 = int_to_ptr.vmem [resolvable:$true] %s114_s17 }
  0x18   :  { %120 = dma.hbm_to_vmem [thread:$0]  %s113_s3, 1024, %s115_s17, [#allocation14], %s2866_s21, %s2866_s21, %s2867_s22  }
  0x19   :  { %2849 = dma.done.wait [#allocation5], 2048  }
  0x1a   :  { %2850 = vsyncadd [#allocation5], 4294965248 }
  0x1b   :  { %2851 = dma.done.wait [#allocation8], 10240  }
  0x1c   :  { %2852 = vsyncadd [#allocation8], 4294957056 }
  0x1d   :  { %2853 = dma.done.wait [#allocation11], 3072  }
  0x1e   :  { %2854 = vsyncadd [#allocation11], 4294964224 }
  0x1f   :  { %2855 = dma.done.wait [#allocation14], 2048  }
  0x20   :  { %2856 = vsyncadd [#allocation14], 4294965248  ;;  %v2981_v0 = vld [vmem:[#allocation4 + $0x78] sm:$0xff]  ;;  %v2983_v1 = vld [vmem:[#allocation4 + $0x70] sm:$0xff]  ;;  %s2872_s24 = smov [#allocation17]   ;;  %s2079_s0 = sshll.u32 %s3992_s12, 4  ;;  %s2080_s0 = int_to_ptr.hbm [resolvable:$true] %s2079_s0 }
  0x21   :  { %2386 = vmatpush.msra.mxu1 %v2981_v0  ;;  %219 = vmatpush.msra.mxu0 %v2981_v0  ;;  %v2987_v2 = vld [vmem:[#allocation4 + $0x68] sm:$0xff]  ;;  %v2993_v3 = vld [vmem:[#allocation4 + $0x60] sm:$0xff]  ;;  %v2998_v4 = vld [vmem:[#allocation4 + $0x58] sm:$0xff]  ;;  %s2077_s25 = sshll.u32 %s2872_s24, 4  ;;  %s2066_s27 = sshll.u32 %s3991_s11, 4  ;;  %s2078_s25 = int_to_ptr.vmem [resolvable:$true] %s2077_s25  ;;  %s2067_s27 = int_to_ptr.hbm [resolvable:$true] %s2066_s27 }
  0x22   :  { %2387 = vmatpush.msra.mxu2 %v2981_v0  ;;  %2388 = vmatpush.msra.mxu3 %v2981_v0  ;;  %v3005_v5 = vld [vmem:[#allocation4 + $0x50] sm:$0xff]  ;;  %v3011_v6 = vld [vmem:[#allocation4 + $0x48] sm:$0xff]  ;;  %v3017_v7 = vld [vmem:[#allocation4 + $0x40] sm:$0xff] }
  0x23   :  { %2389 = vmatpush.msra.mxu1 %v2983_v1  ;;  %220 = vmatpush.msra.mxu0 %v2983_v1  ;;  %v3023_v8 = vld [vmem:[#allocation4 + $0x38] sm:$0xff]  ;;  %v161_v9 = vld [vmem:[#allocation4 + $0x30] sm:$0xff]  ;;  %v160_v10 = vld [vmem:[#allocation4 + $0x28] sm:$0xff] }
  0x24   :  { %2390 = vmatpush.msra.mxu2 %v2983_v1  ;;  %2391 = vmatpush.msra.mxu3 %v2983_v1  ;;  %v159_v11 = vld [vmem:[#allocation4 + $0x20] sm:$0xff]  ;;  %v158_v12 = vld [vmem:[#allocation4 + $0x18] sm:$0xff]  ;;  %v157_v13 = vld [vmem:[#allocation4 + $0x10] sm:$0xff] }
  0x25   :  { %2392 = vmatpush.msra.mxu1 %v2987_v2  ;;  %221 = vmatpush.msra.mxu0 %v2987_v2  ;;  %v156_v14 = vld [vmem:[#allocation4 + $0x8] sm:$0xff]  ;;  %v155_v15 = vld [vmem:[#allocation4] sm:$0xff]  ;;  %v209_v20 = vld [vmem:[#allocation7 + $0x130] sm:$0xff] }
  0x26   :  { %2393 = vmatpush.msra.mxu2 %v2987_v2  ;;  %2394 = vmatpush.msra.mxu3 %v2987_v2  ;;  %v207_v16 = vld [vmem:[#allocation7 + $0x120] sm:$0xff]  ;;  %v208_v18 = vld [vmem:[#allocation7 + $0x128] sm:$0xff]  ;;  %v173_v21 = vld [vmem:[#allocation7 + $0x10] sm:$0xff] }
  0x27   :  { %2395 = vmatpush.msra.mxu1 %v2993_v3  ;;  %222 = vmatpush.msra.mxu0 %v2993_v3  ;;  %v171_v17 = vld [vmem:[#allocation7] sm:$0xff]  ;;  %v172_v19 = vld [vmem:[#allocation7 + $0x8] sm:$0xff]  ;;  %v210_v22 = vld [vmem:[#allocation7 + $0x138] sm:$0xff] }
  0x28   :  { %2396 = vmatpush.msra.mxu2 %v2993_v3  ;;  %2397 = vmatpush.msra.mxu3 %v2993_v3  ;;  %v174_v23 = vld [vmem:[#allocation7 + $0x18] sm:$0xff]  ;;  %v380_v24 = vld [vmem:[#allocation9] sm:$0xff]  ;;  %v381_v26 = vld [vmem:[#allocation9 + $0x8] sm:$0xff] }
  0x29   :  { %2398 = vmatpush.msra.mxu1 %v2998_v4  ;;  %223 = vmatpush.msra.mxu0 %v2998_v4  ;;  %v175_v25 = vld [vmem:[#allocation7 + $0x20] sm:$0xff]  ;;  %v176_v27 = vld [vmem:[#allocation7 + $0x28] sm:$0xff]  ;;  %v382_v28 = vld [vmem:[#allocation9 + $0x10] sm:$0xff] }
  0x2a   :  { %2399 = vmatpush.msra.mxu2 %v2998_v4  ;;  %2400 = vmatpush.msra.mxu3 %v2998_v4  ;;  %v177_v29 = vld [vmem:[#allocation7 + $0x30] sm:$0xff]  ;;  %v383_v30 = vld [vmem:[#allocation9 + $0x18] sm:$0xff]  ;;  %v384_v32 = vld [vmem:[#allocation9 + $0x20] sm:$0xff] }
  0x2b   :  { %2401 = vmatpush.msra.mxu1 %v3005_v5  ;;  %224 = vmatpush.msra.mxu0 %v3005_v5  ;;  %v178_v31 = vld [vmem:[#allocation7 + $0x38] sm:$0xff]  ;;  %v179_v33 = vld [vmem:[#allocation7 + $0x40] sm:$0xff]  ;;  %v385_v34 = vld [vmem:[#allocation9 + $0x28] sm:$0xff] }
  0x2c   :  { %2402 = vmatpush.msra.mxu2 %v3005_v5  ;;  %2403 = vmatpush.msra.mxu3 %v3005_v5  ;;  %v180_v35 = vld [vmem:[#allocation7 + $0x48] sm:$0xff]  ;;  %v386_v36 = vld [vmem:[#allocation9 + $0x30] sm:$0xff]  ;;  %v387_v38 = vld [vmem:[#allocation9 + $0x38] sm:$0xff] }
  0x2d   :  { %2404 = vmatpush.msra.mxu1 %v3011_v6  ;;  %225 = vmatpush.msra.mxu0 %v3011_v6  ;;  %v181_v37 = vld [vmem:[#allocation7 + $0x50] sm:$0xff]  ;;  %v182_v39 = vld [vmem:[#allocation7 + $0x58] sm:$0xff]  ;;  %v388_v40 = vld [vmem:[#allocation9 + $0x40] sm:$0xff] }
  0x2e   :  { %2405 = vmatpush.msra.mxu2 %v3011_v6  ;;  %2406 = vmatpush.msra.mxu3 %v3011_v6  ;;  %v183_v41 = vld [vmem:[#allocation7 + $0x60] sm:$0xff]  ;;  %v389_v42 = vld [vmem:[#allocation9 + $0x48] sm:$0xff]  ;;  %v390_v44 = vld [vmem:[#allocation9 + $0x50] sm:$0xff] }
  0x2f   :  { %2407 = vmatpush.msra.mxu1 %v3017_v7  ;;  %226 = vmatpush.msra.mxu0 %v3017_v7  ;;  %v184_v43 = vld [vmem:[#allocation7 + $0x68] sm:$0xff]  ;;  %v185_v45 = vld [vmem:[#allocation7 + $0x70] sm:$0xff]  ;;  %v391_v46 = vld [vmem:[#allocation9 + $0x58] sm:$0xff] }
  0x30   :  { %2408 = vmatpush.msra.mxu2 %v3017_v7  ;;  %2409 = vmatpush.msra.mxu3 %v3017_v7  ;;  %v186_v47 = vld [vmem:[#allocation7 + $0x78] sm:$0xff]  ;;  %v392_v49 = vld [vmem:[#allocation9 + $0x60] sm:$0xff]  ;;  %v393_v53 = vld [vmem:[#allocation9 + $0x68] sm:$0xff] }
  0x31   :  { %2410 = vmatpush.msra.mxu1 %v3023_v8  ;;  %227 = vmatpush.msra.mxu0 %v3023_v8  ;;  %v187_v51 = vld [vmem:[#allocation7 + $0x80] sm:$0xff]  ;;  %v188_v55 = vld [vmem:[#allocation7 + $0x88] sm:$0xff]  ;;  %v394_v57 = vld [vmem:[#allocation9 + $0x70] sm:$0xff] }
  0x32   :  { %2411 = vmatpush.msra.mxu2 %v3023_v8  ;;  %2412 = vmatpush.msra.mxu3 %v3023_v8  ;;  %v189_v59 = vld [vmem:[#allocation7 + $0x90] sm:$0xff]  ;;  %v395_v61 = vld [vmem:[#allocation9 + $0x78] sm:$0xff] }
  0x33   :  { %2413 = vmatpush.msra.mxu1 %v161_v9  ;;  %228 = vmatpush.msra.mxu0 %v161_v9  ;;  %v190_v63 = vld [vmem:[#allocation7 + $0x98] sm:$0xff] }
  0x34   :  { %2414 = vmatpush.msra.mxu2 %v161_v9  ;;  %2415 = vmatpush.msra.mxu3 %v161_v9 }
  0x35   :  { %2416 = vmatpush.msra.mxu1 %v160_v10  ;;  %229 = vmatpush.msra.mxu0 %v160_v10 }
  0x36   :  { %2417 = vmatpush.msra.mxu2 %v160_v10  ;;  %2418 = vmatpush.msra.mxu3 %v160_v10 }
  0x37   :  { %2419 = vmatpush.msra.mxu1 %v159_v11  ;;  %230 = vmatpush.msra.mxu0 %v159_v11 }
  0x38   :  { %2420 = vmatpush.msra.mxu2 %v159_v11  ;;  %2421 = vmatpush.msra.mxu3 %v159_v11 }
  0x39   :  { %2422 = vmatpush.msra.mxu1 %v158_v12  ;;  %231 = vmatpush.msra.mxu0 %v158_v12 }
  0x3a   :  { %2423 = vmatpush.msra.mxu2 %v158_v12  ;;  %2424 = vmatpush.msra.mxu3 %v158_v12 }
  0x3b   :  { %2425 = vmatpush.msra.mxu1 %v157_v13  ;;  %232 = vmatpush.msra.mxu0 %v157_v13 }
  0x3c   :  { %2426 = vmatpush.msra.mxu2 %v157_v13  ;;  %2427 = vmatpush.msra.mxu3 %v157_v13 }
  0x3d   :  { %2428 = vmatpush.msra.mxu1 %v156_v14  ;;  %233 = vmatpush.msra.mxu0 %v156_v14 }
  0x3e   :  { %2429 = vmatpush.msra.mxu2 %v156_v14  ;;  %2430 = vmatpush.msra.mxu3 %v156_v14 }
  0x3f   :  { %2431 = vmatpush.msra.mxu1 %v155_v15  ;;  %234 = vmatpush.msra.mxu0 %v155_v15 }
  0x40   :  { %343 = vmatmul.f32.vlgmr.msra.gmra.mxu1 %v207_v16  ;;  %235 = vmatmul.f32.vlgmr.msra.gmra.mxu0 %v171_v17  ;;  %v400_v17 = vld [vmem:[#allocation9 + $0xa0] sm:$0xff] }
  0x41   :  { %412 = vmatpush.msrb.mxu1 %v2981_v0  ;;  %2432 = vmatpush.msra.mxu2 %v155_v15 }
  0x42   :  { %2433 = vmatpush.msra.mxu3 %v155_v15 }
  0x43   :  { %413 = vmatpush.msrb.mxu1 %v2983_v1  ;;  %v396_v1 = vld [vmem:[#allocation9 + $0x80] sm:$0xff] }
  0x45   :  { %414 = vmatpush.msrb.mxu1 %v2987_v2 }
  0x47   :  { %415 = vmatpush.msrb.mxu1 %v2993_v3  ;;  %v191_v3 = vld [vmem:[#allocation7 + $0xa0] sm:$0xff] }
  0x48   :  { %346 = vmatmul.f32.gmra.mxu1 %v208_v18  ;;  %238 = vmatmul.f32.gmra.mxu0 %v172_v19  ;;  %v195_v19 = vld [vmem:[#allocation7 + $0xc0] sm:$0xff] }
  0x49   :  { %416 = vmatpush.msrb.mxu1 %v2998_v4 }
  0x4b   :  { %417 = vmatpush.msrb.mxu1 %v3005_v5  ;;  %v397_v5 = vld [vmem:[#allocation9 + $0x88] sm:$0xff] }
  0x4d   :  { %418 = vmatpush.msrb.mxu1 %v3011_v6 }
  0x4f   :  { %419 = vmatpush.msrb.mxu1 %v3017_v7  ;;  %v192_v7 = vld [vmem:[#allocation7 + $0xa8] sm:$0xff] }
  0x50   :  { %349 = vmatmul.f32.gmra.mxu1 %v209_v20  ;;  %241 = vmatmul.f32.gmra.mxu0 %v173_v21  ;;  %v401_v21 = vld [vmem:[#allocation9 + $0xa8] sm:$0xff] }
  0x51   :  { %420 = vmatpush.msrb.mxu1 %v3023_v8 }
  0x53   :  { %421 = vmatpush.msrb.mxu1 %v161_v9  ;;  %v398_v9 = vld [vmem:[#allocation9 + $0x90] sm:$0xff] }
  0x55   :  { %422 = vmatpush.msrb.mxu1 %v160_v10 }
  0x57   :  { %423 = vmatpush.msrb.mxu1 %v159_v11  ;;  %v193_v11 = vld [vmem:[#allocation7 + $0xb0] sm:$0xff] }
  0x58   :  { %352 = vmatmul.f32.gmra.mxu1 %v210_v22  ;;  %244 = vmatmul.f32.gmra.mxu0 %v174_v23  ;;  %v196_v23 = vld [vmem:[#allocation7 + $0xc8] sm:$0xff] }
  0x59   :  { %424 = vmatpush.msrb.mxu1 %v158_v12 }
  0x5b   :  { %425 = vmatpush.msrb.mxu1 %v157_v13  ;;  %v399_v13 = vld [vmem:[#allocation9 + $0x98] sm:$0xff] }
  0x5d   :  { %426 = vmatpush.msrb.mxu1 %v156_v14 }
  0x5f   :  { %427 = vmatpush.msrb.mxu1 %v155_v15  ;;  %v194_v15 = vld [vmem:[#allocation7 + $0xb8] sm:$0xff] }
  0x60   :  { %428 = vmatmul.f32.vlgmr.msrb.gmra.mxu1 %v380_v24  ;;  %247 = vmatmul.f32.gmra.mxu0 %v175_v25  ;;  %v402_v25 = vld [vmem:[#allocation9 + $0xb0] sm:$0xff] }
  0x68   :  { %431 = vmatmul.f32.gmra.mxu1 %v381_v26  ;;  %250 = vmatmul.f32.gmra.mxu0 %v176_v27  ;;  %v197_v27 = vld [vmem:[#allocation7 + $0xd0] sm:$0xff] }
  0x70   :  { %434 = vmatmul.f32.gmra.mxu1 %v382_v28  ;;  %253 = vmatmul.f32.gmra.mxu0 %v177_v29  ;;  %v403_v29 = vld [vmem:[#allocation9 + $0xb8] sm:$0xff] }
  0x78   :  { %437 = vmatmul.f32.gmra.mxu1 %v383_v30  ;;  %256 = vmatmul.f32.gmra.mxu0 %v178_v31  ;;  %v198_v31 = vld [vmem:[#allocation7 + $0xd8] sm:$0xff] }
  0x80   :  { %440 = vmatmul.f32.gmra.mxu1 %v384_v32  ;;  %259 = vmatmul.f32.gmra.mxu0 %v179_v33  ;;  %v404_v33 = vld [vmem:[#allocation9 + $0xc0] sm:$0xff] }
  0x88   :  { %443 = vmatmul.f32.gmra.mxu1 %v385_v34  ;;  %262 = vmatmul.f32.gmra.mxu0 %v180_v35  ;;  %v199_v35 = vld [vmem:[#allocation7 + $0xe0] sm:$0xff] }
  0x90   :  { %446 = vmatmul.f32.gmra.mxu1 %v386_v36  ;;  %265 = vmatmul.f32.gmra.mxu0 %v181_v37  ;;  %v405_v37 = vld [vmem:[#allocation9 + $0xc8] sm:$0xff] }
  0x98   :  { %449 = vmatmul.f32.gmra.mxu1 %v387_v38  ;;  %268 = vmatmul.f32.gmra.mxu0 %v182_v39  ;;  %v200_v39 = vld [vmem:[#allocation7 + $0xe8] sm:$0xff] }
  0xa0   :  { %452 = vmatmul.f32.gmra.mxu1 %v388_v40  ;;  %271 = vmatmul.f32.gmra.mxu0 %v183_v41  ;;  %v406_v41 = vld [vmem:[#allocation9 + $0xd0] sm:$0xff] }
  0xa8   :  { %455 = vmatmul.f32.gmra.mxu1 %v389_v42  ;;  %274 = vmatmul.f32.gmra.mxu0 %v184_v43  ;;  %v201_v43 = vld [vmem:[#allocation7 + $0xf0] sm:$0xff] }
  0xb0   :  { %458 = vmatmul.f32.gmra.mxu1 %v390_v44  ;;  %277 = vmatmul.f32.gmra.mxu0 %v185_v45  ;;  %v407_v45 = vld [vmem:[#allocation9 + $0xd8] sm:$0xff] }
  0xb8   :  { %461 = vmatmul.f32.gmra.mxu1 %v391_v46  ;;  %280 = vmatmul.f32.gmra.mxu0 %v186_v47  ;;  %v202_v47 = vld [vmem:[#allocation7 + $0xf8] sm:$0xff] }
  0xbd   :  { %v3044_v48 = vpop.f32.mrf.mxu1  ;;  %v3046_v50 = vpop.f32.mrf.mxu0 }
  0xbe   :  { %3993 = vst [vmem:[#allocation25_spill] sm:$0xff] %v3044_v48 }
  0xc0   :  { %464 = vmatmul.f32.gmra.mxu1 %v392_v49  ;;  %283 = vmatmul.f32.gmra.mxu0 %v187_v51  ;;  %v408_v51 = vld [vmem:[#allocation9 + $0xe0] sm:$0xff] }
  0xc5   :  { %v3048_v52 = vpop.f32.mrf.mxu1  ;;  %v3050_v54 = vpop.f32.mrf.mxu0 }
  0xc6   :  { %3994 = vst [vmem:[#allocation26_spill] sm:$0xff] %v3048_v52 }
  0xc8   :  { %467 = vmatmul.f32.gmra.mxu1 %v393_v53  ;;  %286 = vmatmul.f32.gmra.mxu0 %v188_v55 }
  0xcd   :  { %v3052_v56 = vpop.f32.mrf.mxu1  ;;  %v3054_v58 = vpop.f32.mrf.mxu0 }
  0xce   :  { %3995 = vst [vmem:[#allocation27_spill] sm:$0xff] %v3052_v56 }
  0xcf   :  { %3996 = vst [vmem:[#allocation28_spill] sm:$0xff] %v3054_v58 }
  0xd0   :  { %470 = vmatmul.f32.gmra.mxu1 %v394_v57  ;;  %289 = vmatmul.f32.gmra.mxu0 %v189_v59  ;;  %v409_v59 = vld [vmem:[#allocation9 + $0xe8] sm:$0xff] }
  0xd5   :  { %v3056_v60 = vpop.f32.mrf.mxu1  ;;  %v3058_v62 = vpop.f32.mrf.mxu0 }
  0xd6   :  { %3997 = vst [vmem:[#allocation29_spill] sm:$0xff] %v3056_v60 }
  0xd7   :  { %3998 = vst [vmem:[#allocation30_spill] sm:$0xff] %v3058_v62 }
  0xd8   :  { %473 = vmatmul.f32.gmra.mxu1 %v395_v61  ;;  %292 = vmatmul.f32.gmra.mxu0 %v190_v63 }
  0xdd   :  { %v3060_v0 = vpop.f32.mrf.mxu1  ;;  %v3062_v2 = vpop.f32.mrf.mxu0 }
  0xde   :  { %3999 = vst [vmem:[#allocation31_spill] sm:$0xff] %v3062_v2 }
  0xe0   :  { %476 = vmatmul.f32.gmra.mxu1 %v396_v1  ;;  %295 = vmatmul.f32.gmra.mxu0 %v191_v3  ;;  %v410_v3 = vld [vmem:[#allocation9 + $0xf0] sm:$0xff] }
  0xe5   :  { %v3064_v4 = vpop.f32.mrf.mxu1  ;;  %v3066_v6 = vpop.f32.mrf.mxu0 }
  0xe6   :  { %4000 = vst [vmem:[#allocation32_spill] sm:$0xff] %v3064_v4 }
  0xe7   :  { %4001 = vst [vmem:[#allocation33_spill] sm:$0xff] %v3066_v6 }
  0xe8   :  { %479 = vmatmul.f32.gmra.mxu1 %v397_v5  ;;  %298 = vmatmul.f32.gmra.mxu0 %v192_v7 }
  0xed   :  { %v3068_v8 = vpop.f32.mrf.mxu1  ;;  %v3070_v10 = vpop.f32.mrf.mxu0 }
  0xee   :  { %4002 = vst [vmem:[#allocation34_spill] sm:$0xff] %v3068_v8 }
  0xef   :  { %4003 = vst [vmem:[#allocation35_spill] sm:$0xff] %v3070_v10 }
  0xf0   :  { %482 = vmatmul.f32.gmra.mxu1 %v398_v9  ;;  %301 = vmatmul.f32.gmra.mxu0 %v193_v11  ;;  %v411_v11 = vld [vmem:[#allocation9 + $0xf8] sm:$0xff] }
  0xf5   :  { %v3072_v12 = vpop.f32.mrf.mxu1  ;;  %v3074_v14 = vpop.f32.mrf.mxu0 }
  0xf6   :  { %4004 = vst [vmem:[#allocation36_spill] sm:$0xff] %v3072_v12 }
  0xf7   :  { %4005 = vst [vmem:[#allocation37_spill] sm:$0xff] %v3074_v14  ;;  %v213_v14 = vld [vmem:[#allocation7 + $0x150] sm:$0xff] }
  0xf8   :  { %485 = vmatmul.f32.gmra.mxu1 %v399_v13  ;;  %304 = vmatmul.f32.gmra.mxu0 %v194_v15 }
  0xfd   :  { %v3076_v16 = vpop.f32.mrf.mxu1  ;;  %v3078_v18 = vpop.f32.mrf.mxu0 }
  0xfe   :  { %4006 = vst [vmem:[#allocation38_spill] sm:$0xff] %v3076_v16 }
  0xff   :  { %4007 = vst [vmem:[#allocation39_spill] sm:$0xff] %v3078_v18 }
 0x100   :  { %488 = vmatmul.f32.gmra.mxu1 %v400_v17  ;;  %307 = vmatmul.f32.gmra.mxu0 %v195_v19 }
 0x105   :  { %v3080_v20 = vpop.f32.mrf.mxu1  ;;  %v3082_v22 = vpop.f32.mrf.mxu0 }
 0x106   :  { %4008 = vst [vmem:[#allocation40_spill] sm:$0xff] %v3080_v20 }
 0x107   :  { %4009 = vst [vmem:[#allocation41_spill] sm:$0xff] %v3082_v22 }
 0x108   :  { %491 = vmatmul.f32.gmra.mxu1 %v401_v21  ;;  %310 = vmatmul.f32.gmra.mxu0 %v196_v23 }
 0x10d   :  { %v3084_v24 = vpop.f32.mrf.mxu1  ;;  %v3086_v26 = vpop.f32.mrf.mxu0 }
 0x10e   :  { %4010 = vst [vmem:[#allocation42_spill] sm:$0xff] %v3084_v24 }
 0x10f   :  { %4011 = vst [vmem:[#allocation43_spill] sm:$0xff] %v3086_v26 }
 0x110   :  { %494 = vmatmul.f32.gmra.mxu1 %v402_v25  ;;  %313 = vmatmul.f32.gmra.mxu0 %v197_v27 }
 0x115   :  { %v3088_v28 = vpop.f32.mrf.mxu1  ;;  %v3090_v30 = vpop.f32.mrf.mxu0 }
 0x116   :  { %4012 = vst [vmem:[#allocation44_spill] sm:$0xff] %v3088_v28 }
 0x117   :  { %4013 = vst [vmem:[#allocation45_spill] sm:$0xff] %v3090_v30 }
 0x118   :  { %497 = vmatmul.f32.gmra.mxu1 %v403_v29  ;;  %316 = vmatmul.f32.gmra.mxu0 %v198_v31 }
 0x11d   :  { %v3092_v32 = vpop.f32.mrf.mxu1  ;;  %v272_v34 = vpop.f32.mrf.mxu0 }
 0x11e   :  { %4014 = vst [vmem:[#allocation46_spill] sm:$0xff] %v3092_v32 }
 0x120   :  { %500 = vmatmul.f32.gmra.mxu1 %v404_v33  ;;  %319 = vmatmul.f32.gmra.mxu0 %v199_v35 }
 0x125   :  { %v3094_v36 = vpop.f32.mrf.mxu1  ;;  %v275_v38 = vpop.f32.mrf.mxu0 }
 0x126   :  { %4015 = vst [vmem:[#allocation47_spill] sm:$0xff] %v3094_v36 }
 0x128   :  { %503 = vmatmul.f32.gmra.mxu1 %v405_v37  ;;  %322 = vmatmul.f32.gmra.mxu0 %v200_v39 }
 0x12d   :  { %v3096_v40 = vpop.f32.mrf.mxu1  ;;  %v278_v42 = vpop.f32.mrf.mxu0 }
 0x12e   :  { %4016 = vst [vmem:[#allocation48_spill] sm:$0xff] %v3096_v40 }
 0x130   :  { %506 = vmatmul.f32.gmra.mxu1 %v406_v41  ;;  %325 = vmatmul.f32.gmra.mxu0 %v201_v43 }
 0x135   :  { %v3098_v44 = vpop.f32.mrf.mxu1  ;;  %v281_v46 = vpop.f32.mrf.mxu0 }
 0x136   :  { %4017 = vst [vmem:[#allocation49_spill] sm:$0xff] %v3098_v44 }
 0x138   :  { %509 = vmatmul.f32.gmra.mxu1 %v407_v45  ;;  %328 = vmatmul.f32.gmra.mxu0 %v202_v47 }
 0x13d   :  { %v465_v49 = vpop.f32.mrf.mxu1  ;;  %v284_v53 = vpop.f32.mrf.mxu0 }
 0x13e   :  { %v3100_v55 = vadd.f32 %v465_v49, %v272_v34 }
 0x140   :  { %4018 = vst [vmem:[#allocation50_spill] sm:$0xff] %v3100_v55  ;;  %512 = vmatmul.f32.gmra.mxu1 %v408_v51 }
 0x145   :  { %v468_v57 = vpop.f32.mrf.mxu1  ;;  %v287_v63 = vpop.f32.mrf.mxu0 }
 0x146   :  { %v3102_v61 = vadd.f32 %v468_v57, %v275_v38 }
 0x148   :  { %4019 = vst [vmem:[#allocation51_spill] sm:$0xff] %v3102_v61  ;;  %515 = vmatmul.f32.gmra.mxu1 %v409_v59 }
 0x14d   :  { %v471_v1 = vpop.f32.mrf.mxu1  ;;  %v290_v7 = vpop.f32.mrf.mxu0 }
 0x14e   :  { %v3104_v5 = vadd.f32 %v471_v1, %v278_v42  ;;  %v3111_v1 = vld [vmem:[%s3985_s5] ss:$0 sm:$0xff] }
 0x150   :  { %4020 = vst [vmem:[#allocation52_spill] sm:$0xff] %v3104_v5  ;;  %518 = vmatmul.f32.gmra.mxu1 %v410_v3 }
 0x155   :  { %v474_v9 = vpop.f32.mrf.mxu1  ;;  %v293_v15 = vpop.f32.mrf.mxu0 }
 0x156   :  { %v3106_v13 = vadd.f32 %v474_v9, %v281_v46 }
 0x158   :  { %4021 = vst [vmem:[#allocation53_spill] sm:$0xff] %v3106_v13  ;;  %521 = vmatmul.f32.gmra.mxu1 %v411_v11 }
 0x15d   :  { %v477_v17 = vpop.f32.mrf.mxu1  ;;  %v296_v23 = vpop.f32.mrf.mxu0 }
 0x15e   :  { %v865_v19 = vadd.f32 %v477_v17, %v284_v53 }
 0x165   :  { %v480_v21 = vpop.f32.mrf.mxu1  ;;  %v299_v31 = vpop.f32.mrf.mxu0 }
 0x166   :  { %v866_v25 = vadd.f32 %v480_v21, %v287_v63 }
 0x16d   :  { %v483_v27 = vpop.f32.mrf.mxu1  ;;  %v302_v35 = vpop.f32.mrf.mxu0 }
 0x16e   :  { %v867_v29 = vadd.f32 %v483_v27, %v290_v7  ;;  %v885_v7 = vadd.f32 %v3111_v1, %v865_v19 }
 0x170   :  { %v2116_v11 = vmul.f32 -1.442695, %v885_v7 }
 0x172   :  { %2451 = vpow2.f32 %v2116_v11 }
 0x175   :  { %v486_v33 = vpop.f32.mrf.mxu1  ;;  %v305_v39 = vpop.f32.mrf.mxu0 }
 0x176   :  { %v868_v34 = vadd.f32 %v486_v33, %v293_v15  ;;  %v886_v15 = vadd.f32 %v3111_v1, %v866_v25 }
 0x178   :  { %v2452_v27 = vpop.eup %2451  ;;  %v888_v33 = vadd.f32 %v3111_v1, %v868_v34 }
 0x17d   :  { %v489_v37 = vpop.f32.mrf.mxu1  ;;  %v308_v45 = vpop.f32.mrf.mxu0 }
 0x17e   :  { %v869_v38 = vadd.f32 %v489_v37, %v296_v23  ;;  %v2117_v23 = vmul.f32 -1.442695, %v886_v15  ;;  %v3118_v37 = vadd.f32 1.0, %v2452_v27 }
 0x180   :  { %2453 = vpow2.f32 %v2117_v23 }
 0x181   :  { %2455 = vrcp.f32 %v3118_v37 }
 0x185   :  { %v492_v41 = vpop.f32.mrf.mxu1  ;;  %v311_v51 = vpop.f32.mrf.mxu0 }
 0x186   :  { %v870_v42 = vadd.f32 %v492_v41, %v299_v31  ;;  %v887_v31 = vadd.f32 %v3111_v1, %v867_v29  ;;  %v2454_v7 = vpop.eup %2453 }
 0x188   :  { %v890_v19 = vadd.f32 %v3111_v1, %v870_v42  ;;  %v2118_v41 = vmul.f32 -1.442695, %v887_v31  ;;  %v3131_v31 = vpop.eup %2455 }
 0x18a   :  { %v2121_v34 = vmul.f32 -1.442695, %v890_v19  ;;  %2457 = vpow2.f32 %v2118_v41 }
 0x18d   :  { %v495_v43 = vpop.f32.mrf.mxu1  ;;  %v314_v59 = vpop.f32.mrf.mxu0 }
 0x18e   :  { %v871_v46 = vadd.f32 %v495_v43, %v302_v35  ;;  %v889_v35 = vadd.f32 %v3111_v1, %v869_v38 }
 0x190   :  { %v891_v25 = vadd.f32 %v3111_v1, %v871_v46  ;;  %v2120_v11 = vmul.f32 -1.442695, %v889_v35  ;;  %v3126_v46 = vadd.f32 1.0, %v2454_v7  ;;  %v2458_v35 = vpop.eup %2457 }
 0x192   :  { %v2122_v42 = vmul.f32 -1.442695, %v891_v25 }
 0x195   :  { %v498_v47 = vpop.f32.mrf.mxu1  ;;  %v317_v3 = vpop.f32.mrf.mxu0 }
 0x196   :  { %v872_v49 = vadd.f32 %v498_v47, %v305_v39 }
 0x198   :  { %v892_v29 = vadd.f32 %v3111_v1, %v872_v49 }
 0x19d   :  { %v501_v53 = vpop.f32.mrf.mxu1  ;;  %v320_v21 = vpop.f32.mrf.mxu0 }
 0x19e   :  { %v873_v57 = vadd.f32 %v501_v53, %v308_v45  ;;  %v2119_v45 = vmul.f32 -1.442695, %v888_v33 }
 0x1a0   :  { %v893_v38 = vadd.f32 %v3111_v1, %v873_v57  ;;  %2459 = vpow2.f32 %v2119_v45  ;;  %v211_v57 = vld [vmem:[#allocation7 + $0x140] sm:$0xff] }
 0x1a1   :  { %2461 = vpow2.f32 %v2120_v11  ;;  %355 = vmatmul.f32.vlgmr.msra.gmra.mxu2 %v211_v57 }
 0x1a2   :  { %2463 = vpow2.f32 %v2121_v34 }
 0x1a3   :  { %2465 = vpow2.f32 %v2122_v42 }
 0x1a4   :  { %2467 = vrcp.f32 %v3126_v46 }
 0x1a5   :  { %v504_v63 = vpop.f32.mrf.mxu1  ;;  %v323_v53 = vpop.f32.mrf.mxu0 }
 0x1a6   :  { %v874_v43 = vadd.f32 %v504_v63, %v311_v51  ;;  %v2124_v63 = vmul.f32 -1.442695, %v893_v38  ;;  %v2460_v41 = vpop.eup %2459 }
 0x1a7   :  { %v2462_v45 = vpop.eup %2461 }
 0x1a8   :  { %v894_v27 = vadd.f32 %v3111_v1, %v874_v43  ;;  %v2464_v7 = vpop.eup %2463  ;;  %v3141_v34 = vadd.f32 1.0, %v2462_v45 }
 0x1a9   :  { %v2466_v11 = vpop.eup %2465  ;;  %v3143_v42 = vadd.f32 1.0, %v2464_v7 }
 0x1ad   :  { %v507_v9 = vpop.f32.mrf.mxu1  ;;  %v326_v43 = vpop.f32.mrf.mxu0 }
 0x1ae   :  { %v875_v47 = vadd.f32 %v507_v9, %v314_v59  ;;  %v2123_v59 = vmul.f32 -1.442695, %v892_v29  ;;  %v3137_v29 = vadd.f32 1.0, %v2460_v41 }
 0x1b0   :  { %v895_v51 = vadd.f32 %v3111_v1, %v875_v47  ;;  %2469 = vpow2.f32 %v2123_v59  ;;  %v3146_v59 = vadd.f32 1.0, %v2466_v11 }
 0x1b1   :  { %2471 = vpow2.f32 %v2124_v63 }
 0x1b2   :  { %v2126_v33 = vmul.f32 -1.442695, %v895_v51 }
 0x1b5   :  { %v510_v17 = vpop.f32.mrf.mxu1 }
 0x1b6   :  { %v876_v15 = vadd.f32 %v510_v17, %v317_v3  ;;  %v2125_v17 = vmul.f32 -1.442695, %v894_v27 }
 0x1b8   :  { %v896_v49 = vadd.f32 %v3111_v1, %v876_v15  ;;  %2473 = vpow2.f32 %v2125_v17  ;;  %v3139_v15 = vpop.eup %2467 }
 0x1b9   :  { %2475 = vpow2.f32 %v2126_v33 }
 0x1ba   :  { %v2127_v19 = vmul.f32 -1.442695, %v896_v49 }
 0x1bc   :  { %2477 = vpow2.f32 %v2127_v19  ;;  %v329_v19 = vpop.f32.mrf.mxu0 }
 0x1bd   :  { %v513_v39 = vpop.f32.mrf.mxu1 }
 0x1be   :  { %v877_v23 = vadd.f32 %v513_v39, %v320_v21 }
 0x1c0   :  { %v897_v3 = vadd.f32 %v3111_v1, %v877_v23  ;;  %v2470_v23 = vpop.eup %2469 }
 0x1c1   :  { %v2472_v51 = vpop.eup %2471 }
 0x1c2   :  { %v2128_v25 = vmul.f32 -1.442695, %v897_v3  ;;  %v2474_v49 = vpop.eup %2473  ;;  %v3154_v17 = vadd.f32 1.0, %v2472_v51 }
 0x1c3   :  { %v2476_v3 = vpop.eup %2475 }
 0x1c4   :  { %2479 = vpow2.f32 %v2128_v25  ;;  %v2478_v57 = vpop.eup %2477  ;;  %v3159_v41 = vadd.f32 1.0, %v2476_v3 }
 0x1c5   :  { %v516_v9 = vpop.f32.mrf.mxu1 }
 0x1c6   :  { %v878_v21 = vadd.f32 %v516_v9, %v323_v53  ;;  %v3135_v53 = vadd.f32 1.0, %v2458_v35  ;;  %v3151_v9 = vadd.f32 1.0, %v2470_v23  ;;  %v3157_v35 = vadd.f32 1.0, %v2474_v49 }
 0x1c7   :  { %vm1120_vm8 = vweird.f32 %v3159_v41 }
 0x1c8   :  { %v898_v39 = vadd.f32 %v3111_v1, %v878_v21 }
 0x1ca   :  { %v2129_v47 = vmul.f32 -1.442695, %v898_v39  ;;  %v2480_v33 = vpop.eup %2479 }
 0x1cb   :  { %v3169_v7 = vadd.f32 1.0, %v2480_v33 }
 0x1cc   :  { %2481 = vpow2.f32 %v2129_v47 }
 0x1cd   :  { %v519_v38 = vpop.f32.mrf.mxu1  ;;  %2483 = vrcp.f32 %v3135_v53  ;;  %vm1150_vm1 = vweird.f32 %v3169_v7 }
 0x1ce   :  { %v879_v27 = vadd.f32 %v519_v38, %v326_v43  ;;  %2485 = vrcp.f32 %v3137_v29  ;;  %v3164_v43 = vadd.f32 1.0, %v2478_v57 }
 0x1cf   :  { %2487 = vrcp.f32 %v3141_v34 }
 0x1d0   :  { %v899_v63 = vadd.f32 %v3111_v1, %v879_v27  ;;  %2489 = vrcp.f32 %v3143_v42  ;;  %vm1135_vm4 = vweird.f32 %v3164_v43 }
 0x1d1   :  { %2491 = vrcp.f32 %v3146_v59 }
 0x1d2   :  { %v2130_v21 = vmul.f32 -1.442695, %v899_v63  ;;  %v2482_v39 = vpop.eup %2481 }
 0x1d3   :  { %v3161_v25 = vpop.eup %2483  ;;  %v3174_v23 = vadd.f32 1.0, %v2482_v39 }
 0x1d4   :  { %2493 = vpow2.f32 %v2130_v21  ;;  %v3166_v47 = vpop.eup %2485 }
 0x1d5   :  { %2495 = vrcp.f32 %v3151_v9  ;;  %v522_v45 = vpop.f32.mrf.mxu1  ;;  %v3171_v38 = vpop.eup %2487  ;;  %v1011_v5 = vmul.f32 %v3166_v47, %v3137_v29  ;;  %vm1165_vm11 = vweird.f32 %v3174_v23 }
 0x1d6   :  { %2497 = vrcp.f32 %v3154_v17  ;;  %v880_v11 = vadd.f32 %v522_v45, %v329_v19  ;;  %v3176_v27 = vpop.eup %2489  ;;  %v212_v45 = vld [vmem:[#allocation7 + $0x148] sm:$0xff] }
 0x1d7   :  { %2499 = vrcp.f32 %v3157_v35  ;;  %v3180_v49 = vpop.eup %2491  ;;  %358 = vmatmul.f32.gmra.mxu2 %v212_v45  ;;  %v1041_v56 = vmul.f32 %v3176_v27, %v3143_v42  ;;  %v1026_v45 = vmul.f32 %v3171_v38, %v3141_v34  ;;  %v1012_v18 = vsub.f32 1.0, %v1011_v5 }
 0x1d8   :  { %2501 = vrcp.f32 %v3159_v41  ;;  %v900_v51 = vadd.f32 %v3111_v1, %v880_v11  ;;  %v966_v1 = vmul.f32 %v3131_v31, %v3118_v37  ;;  %v981_v11 = vmul.f32 %v3139_v15, %v3126_v46 }
 0x1d9   :  { %2503 = vrcp.f32 %v3164_v43  ;;  %v1056_v60 = vmul.f32 %v3180_v49, %v3146_v59  ;;  %v1042_v10 = vsub.f32 1.0, %v1041_v56  ;;  %v1027_v20 = vsub.f32 1.0, %v1026_v45 }
 0x1da   :  { %v2494_v63 = vpop.eup %2493  ;;  %2505 = vrcp.f32 %v3169_v7  ;;  %v2131_v3 = vmul.f32 -1.442695, %v900_v51  ;;  %v967_v61 = vsub.f32 1.0, %v966_v1  ;;  %v982_v52 = vsub.f32 1.0, %v981_v11 }
 0x1db   :  { %v3184_v57 = vpop.eup %2495  ;;  %2507 = vrcp.f32 %v3174_v23  ;;  %v3187_v21 = vadd.f32 1.0, %v2494_v63  ;;  %v1057_v24 = vsub.f32 1.0, %v1056_v60 }
 0x1dc   :  { %v3189_v33 = vpop.eup %2497  ;;  %2509 = vpow2.f32 %v2131_v3  ;;  %v996_v3 = vmul.f32 %v3161_v25, %v3135_v53  ;;  %v1071_v26 = vmul.f32 %v3184_v57, %v3151_v9  ;;  %v3238_v62 = vmul.f32 %v3139_v15, %v982_v52 }
 0x1dd   :  { %v3191_v19 = vpop.eup %2499  ;;  %2511 = vrcp.f32 %v3187_v21  ;;  %v1086_v1 = vmul.f32 %v3189_v33, %v3154_v17  ;;  %v3241_v8 = vmul.f32 %v3131_v31, %v967_v61  ;;  %v3257_v52 = vmul.f32 %v3171_v38, %v1027_v20 }
 0x1de   :  { %v3196_v39 = vpop.eup %2501  ;;  %v1101_v40 = vmul.f32 %v3191_v19, %v3157_v35  ;;  %v1072_v2 = vsub.f32 1.0, %v1071_v26  ;;  %v3254_v26 = vmul.f32 %v3176_v27, %v1042_v10  ;;  %vm1180_vm6 = vweird.f32 %v3187_v21 }
 0x1df   :  { %v3200_v51 = vpop.eup %2503  ;;  %v1116_v11 = vmul.f32 %v3196_v39, %v3159_v41  ;;  %v1087_v16 = vsub.f32 1.0, %v1086_v1  ;;  %361 = vmatmul.f32.gmra.mxu2 %v213_v14  ;;  %v3251_v14 = vmul.f32 %v3180_v49, %v1057_v24  ;;  %vm1121_vm5 = vweird.f32 %v3196_v39 }
 0x1e0   :  { %v3202_v63 = vpop.eup %2505  ;;  %v1131_v32 = vmul.f32 %v3200_v51, %v3164_v43  ;;  %v1102_v6 = vsub.f32 1.0, %v1101_v40  ;;  %vm1136_vm0 = vweird.f32 %v3200_v51  ;;  %v1184_v5 = vand.u32 2147483647, %v3187_v21 }
 0x1e1   :  { %v3206_v13 = vpop.eup %2507  ;;  %v1146_v22 = vmul.f32 %v3202_v63, %v3169_v7  ;;  %vm1106_vm9 = vweird.f32 %v3191_v19  ;;  %vm1151_vm12 = vweird.f32 %v3202_v63  ;;  %vm1076_vm15 = vweird.f32 %v3184_v57 }
 0x1e2   :  { %v2510_v55 = vpop.eup %2509  ;;  %v1161_v36 = vmul.f32 %v3206_v13, %v3174_v23  ;;  %v1132_v4 = vsub.f32 1.0, %v1131_v32  ;;  %v3264_v32 = vmul.f32 %v3189_v33, %v1087_v16  ;;  %vm1166_vm3 = vweird.f32 %v3206_v13 }
 0x1e3   :  { %v3216_v44 = vpop.eup %2511  ;;  %v3218_v30 = vadd.f32 1.0, %v2510_v55  ;;  %v997_v55 = vsub.f32 1.0, %v996_v3  ;;  %v1117_v3 = vsub.f32 1.0, %v1116_v11  ;;  %v1147_v58 = vsub.f32 1.0, %v1146_v22  ;;  %vm3306_vm14 = vmor %vm1165_vm11, %vm1166_vm3 }
 0x1e4   :  { %v1176_v48 = vmul.f32 %v3216_v44, %v3187_v21  ;;  %v1162_v12 = vsub.f32 1.0, %v1161_v36  ;;  %v1133_v16 = vmul.f32 %v3200_v51, %v1132_v4  ;;  %vm1181_vm2 = vweird.f32 %v3216_v44 }
 0x1e5   :  { %2513 = vrcp.f32 %v3218_v30  ;;  %v3247_v56 = vmul.f32 %v3161_v25, %v997_v55  ;;  %v1118_v20 = vmul.f32 %v3196_v39, %v1117_v3  ;;  %v1148_v40 = vmul.f32 %v3202_v63, %v1147_v58  ;;  %vm3292_vm10 = vmor %vm1180_vm6, %vm1181_vm2 }
 0x1e6   :  { %v1177_v28 = vsub.f32 1.0, %v1176_v48  ;;  %v3244_v48 = vmul.f32 %v3166_v47, %v1012_v18  ;;  %v3261_v18 = vmul.f32 %v3191_v19, %v1102_v6  ;;  %v1163_v10 = vmul.f32 %v3206_v13, %v1162_v12  ;;  %v214_v12 = vld [vmem:[#allocation7 + $0x158] sm:$0xff] }
 0x1e7   :  { %v1154_v6 = vand.u32 2147483647, %v3169_v7  ;;  %v1201_v58 = vand.u32 2147483648, %v3218_v30  ;;  %v1186_v4 = vand.u32 2147483648, %v3187_v21  ;;  %364 = vmatmul.f32.gmra.mxu2 %v214_v12  ;;  %v1199_v1 = vand.u32 2147483647, %v3218_v30 }
 0x1e8   :  { %v1178_v60 = vmul.f32 %v3216_v44, %v1177_v28  ;;  %v3267_v28 = vmul.f32 %v3184_v57, %v1072_v2  ;;  %v1164_v11 = vadd.f32 %v3206_v13, %v1163_v10  ;;  %v1169_v21 = vand.u32 2147483647, %v3174_v23 }
 0x1e9   :  { %v1171_v3 = vand.u32 2147483648, %v3174_v23  ;;  %vm1195_vm13 = vweird.f32 %v3218_v30  ;;  %vm1091_vm2 = vweird.f32 %v3189_v33  ;;  %v1202_v23 = vor.u32 1.1754944e-38, %v1201_v58  ;;  %v2611_v58 = vld [vmem:[#allocation4 + $0x78] sm:$0xff] }
 0x1ea   :  { %v1179_v2 = vadd.f32 %v3216_v44, %v1178_v60  ;;  %v1156_v12 = vand.u32 2147483648, %v3169_v7  ;;  %vm1185_vm3 = vcmp.eq.f32.partialorder %v1184_v5, 8.507059e+37  ;;  %vm1090_vm11 = vweird.f32 %v3154_v17 }
 0x1eb   :  { %v2514_v36 = vpop.eup %2513  ;;  %v1172_v22 = vor.u32 1.1754944e-38, %v1171_v3  ;;  %v1104_v10 = vadd.f32 %v3191_v19, %v3261_v18  ;;  %v2613_v18 = vld [vmem:[#allocation4 + $0x68] sm:$0xff] }
 0x1ec   :  { %v1191_v24 = vmul.f32 %v2514_v36, %v3218_v30  ;;  %vm1196_vm7 = vweird.f32 %v2514_v36  ;;  %v1187_v30 = vor.u32 1.1754944e-38, %v1186_v4  ;;  %v1119_v4 = vadd.f32 %v3196_v39, %v1118_v20  ;;  %v2612_v20 = vld [vmem:[#allocation4 + $0x70] sm:$0xff] }
 0x1ed   :  { %vm1197_vm6 = vmor %vm1195_vm13, %vm1196_vm7  ;;  %vm1170_vm13 = vcmp.eq.f32.partialorder %v1169_v21, 8.507059e+37  ;;  %v1124_v21 = vand.u32 2147483647, %v3159_v41 }
 0x1ee   :  { %v1192_v61 = vsub.f32 1.0, %v1191_v24  ;;  %v1183_v24 = vsel %vm3292_vm10, %v3216_v44, %v1179_v2  ;;  %v1134_v44 = vadd.f32 %v3200_v51, %v1133_v16  ;;  %vm1200_vm10 = vcmp.eq.f32.partialorder %v1199_v1, 8.507059e+37  ;;  %vm3325_vm7 = vmor %vm1150_vm1, %vm1151_vm12 }
 0x1ef   :  { %v1188_v55 = vsel %vm1185_vm3, %v1187_v30, %v1183_v24  ;;  %vm3340_vm1 = vmor %vm1135_vm4, %vm1136_vm0  ;;  %vm1155_vm12 = vcmp.eq.f32.partialorder %v1154_v6, 8.507059e+37  ;;  %vm1060_vm0 = vweird.f32 %v3146_v59  ;;  %vm1046_vm4 = vweird.f32 %v3176_v27 }
 0x1f0   :  { %v1193_v45 = vmul.f32 %v2514_v36, %v1192_v61  ;;  %v1149_v61 = vadd.f32 %v3202_v63, %v1148_v40  ;;  %v1235_v24 = vmul.f32 %v2612_v20, %v1188_v55  ;;  %v1111_v6 = vand.u32 2147483648, %v3157_v35 }
 0x1f2   :  { %v1194_v60 = vadd.f32 %v2514_v36, %v1193_v45  ;;  %v1168_v45 = vsel %vm3306_vm14, %v3206_v13, %v1164_v11  ;;  %v1153_v13 = vsel %vm3325_vm7, %v3202_v63, %v1149_v61  ;;  %vm1075_vm14 = vweird.f32 %v3151_v9 }
 0x1f3   :  { %v1173_v1 = vsel %vm1170_vm13, %v1172_v22, %v1168_v45  ;;  %v1157_v11 = vor.u32 1.1754944e-38, %v1156_v12  ;;  %v1126_v63 = vand.u32 2147483648, %v3159_v41  ;;  %v1138_v22 = vsel %vm3340_vm1, %v3200_v51, %v1134_v44 }
 0x1f4   :  { %v1198_v2 = vsel %vm1197_vm6, %v2514_v36, %v1194_v60  ;;  %v1141_v36 = vand.u32 2147483648, %v3164_v43  ;;  %vm1061_vm6 = vweird.f32 %v3180_v49  ;;  %v203_v60 = vld [vmem:[#allocation7 + $0x100] sm:$0xff]  ;;  %v1109_v51 = vand.u32 2147483647, %v3157_v35 }
 0x1f5   :  { %v1203_v40 = vsel %vm1200_vm10, %v1202_v23, %v1198_v2  ;;  %331 = vmatmul.f32.gmra.mxu0 %v203_v60  ;;  %v1158_v61 = vsel %vm1155_vm12, %v1157_v11, %v1153_v13  ;;  %vm3359_vm10 = vmor %vm1120_vm8, %vm1121_vm5  ;;  %v1234_v30 = vmul.f32 %v2613_v18, %v1173_v1  ;;  %v4032_v12 = vand.u32 2147483647, %v3164_v43  ;;  %v204_v60 = vld [vmem:[#allocation7 + $0x108] sm:$0xff] }
 0x1f6   :  { %v1236_v5 = vmul.f32 %v2611_v58, %v1203_v40  ;;  %v1142_v23 = vor.u32 1.1754944e-38, %v1141_v36  ;;  %v1123_v44 = vsel %vm3359_vm10, %v3196_v39, %v1119_v4  ;;  %v1089_v41 = vadd.f32 %v3189_v33, %v3264_v32  ;;  %v2614_v32 = vld [vmem:[#allocation4 + $0x60] sm:$0xff]  ;;  %vm3395_vm10 = vmor %vm1090_vm11, %vm1091_vm2  ;;  %v216_v43 = vld [vmem:[#allocation7 + $0x168] sm:$0xff] }
 0x1f7   :  { %vm1140_vm3 = vcmp.eq.f32.partialorder %v4032_v12, 8.507059e+37  ;;  %vm1045_vm5 = vweird.f32 %v3143_v42  ;;  %vm1031_vm8 = vweird.f32 %v3171_v38  ;;  %v1127_v45 = vor.u32 1.1754944e-38, %v1126_v63 }
 0x1f8   :  { %1237 = vmatpush.msrb.mxu2 %v1236_v5  ;;  %v1143_v2 = vsel %vm1140_vm3, %v1142_v23, %v1138_v22  ;;  %vm4033_vm7 = vweird.f32 %v3157_v35  ;;  %v1094_v40 = vand.u32 2147483647, %v3154_v17  ;;  %v1096_v39 = vand.u32 2147483648, %v3154_v17  ;;  %v205_v5 = vld [vmem:[#allocation7 + $0x110] sm:$0xff] }
 0x1f9   :  { %vm3378_vm13 = vmor %vm4033_vm7, %vm1106_vm9  ;;  %v1233_v55 = vmul.f32 %v2614_v32, %v1158_v61  ;;  %vm1125_vm1 = vcmp.eq.f32.partialorder %v1124_v21, 8.507059e+37  ;;  %v1074_v36 = vadd.f32 %v3184_v57, %v3267_v28  ;;  %vm1030_vm9 = vweird.f32 %v3141_v34  ;;  %v2615_v28 = vld [vmem:[#allocation4 + $0x58] sm:$0xff] }
 0x1fa   :  { %1238 = vmatpush.msrb.mxu2 %v1235_v24  ;;  %v1108_v16 = vsel %vm3378_vm13, %v3191_v19, %v1104_v10  ;;  %vm1016_vm12 = vweird.f32 %v3166_v47  ;;  %v1128_v35 = vsel %vm1125_vm1, %v1127_v45, %v1123_v44  ;;  %v1112_v58 = vor.u32 1.1754944e-38, %v1111_v6  ;;  %vm3412_vm7 = vmor %vm1075_vm14, %vm1076_vm15  ;;  %v3473_v32 = vld [vmem:[#allocation4 + $0x38] sm:$0xff] }
 0x1fb   :  { %v1079_v13 = vand.u32 2147483647, %v3151_v9  ;;  %v1081_v19 = vand.u32 2147483648, %v3151_v9  ;;  %v1232_v4 = vmul.f32 %v2615_v28, %v1143_v2  ;;  %vm1110_vm3 = vcmp.eq.f32.partialorder %v1109_v51, 8.507059e+37  ;;  %vm3429_vm1 = vmor %vm1060_vm0, %vm1061_vm6 }
 0x1fc   :  { %1239 = vmatpush.msrb.mxu2 %v1234_v30  ;;  %v1093_v1 = vsel %vm3395_vm10, %v3189_v33, %v1089_v41  ;;  %v1059_v11 = vadd.f32 %v3180_v49, %v3251_v14  ;;  %vm1015_vm2 = vweird.f32 %v3137_v29  ;;  %vm1001_vm11 = vweird.f32 %v3161_v25  ;;  %v2616_v14 = vld [vmem:[#allocation4 + $0x50] sm:$0xff] }
 0x1fd   :  { %v1113_v17 = vsel %vm1110_vm3, %v1112_v58, %v1108_v16  ;;  %v1097_v3 = vor.u32 1.1754944e-38, %v1096_v39  ;;  %v1064_v63 = vand.u32 2147483647, %v3146_v59  ;;  %v1066_v33 = vand.u32 2147483648, %v3146_v59  ;;  %334 = vmatmul.f32.gmra.mxu0 %v204_v60  ;;  %vm3449_vm3 = vmor %vm1045_vm5, %vm1046_vm4  ;;  %v3527_v60 = vld [vmem:[#allocation4 + $0x20] sm:$0xff]  ;;  %v1207_v30 = vld [vmem:[#allocation10 + $0x10] sm:$0xff] }
 0x1fe   :  { %1240 = vmatpush.msrb.mxu2 %v1233_v55  ;;  %v1231_v20 = vmul.f32 %v2616_v14, %v1128_v35  ;;  %vm1095_vm13 = vcmp.eq.f32.partialorder %v1094_v40, 8.507059e+37  ;;  %v1078_v24 = vsel %vm3412_vm7, %v3184_v57, %v1074_v36  ;;  %v1044_v9 = vadd.f32 %v3176_v27, %v3254_v26  ;;  %v3435_v26 = vld [vmem:[#allocation4 + $0x48] sm:$0xff]  ;;  %vm3467_vm4 = vmor %vm1030_vm9, %vm1031_vm8  ;;  %v4052_v36 = vld [vmem:[#allocation32_spill] sm:$0xff] }
 0x1ff   :  { %vm1000_vm15 = vweird.f32 %v3135_v53  ;;  %vm986_vm14 = vweird.f32 %v3139_v15  ;;  %v1098_v22 = vsel %vm1095_vm13, %v1097_v3, %v1093_v1  ;;  %v1082_v10 = vor.u32 1.1754944e-38, %v1081_v19  ;;  %vm3485_vm8 = vmor %vm1015_vm2, %vm1016_vm12 }
 0x200   :  { %1241 = vmatpush.msrb.mxu2 %v1232_v4  ;;  %v1049_v57 = vand.u32 2147483647, %v3143_v42  ;;  %v1051_v23 = vand.u32 2147483648, %v3143_v42  ;;  %v1230_v7 = vmul.f32 %v3435_v26, %v1113_v17  ;;  %vm1080_vm10 = vcmp.eq.f32.partialorder %v1079_v13, 8.507059e+37  ;;  %vm3503_vm12 = vmor %vm1000_vm15, %vm1001_vm11  ;;  %v4054_v4 = vld [vmem:[#allocation34_spill] sm:$0xff] }
 0x201   :  { %v1063_v51 = vsel %vm3429_vm1, %v3180_v49, %v1059_v11  ;;  %v1029_v59 = vadd.f32 %v3171_v38, %v3257_v52  ;;  %vm985_vm6 = vweird.f32 %v3126_v46  ;;  %vm971_vm0 = vweird.f32 %v3131_v31  ;;  %v3455_v52 = vld [vmem:[#allocation4 + $0x40] sm:$0xff] }
 0x202   :  { %1242 = vmatpush.msrb.mxu2 %v1231_v20  ;;  %v1083_v6 = vsel %vm1080_vm10, %v1082_v10, %v1078_v24  ;;  %v1067_v18 = vor.u32 1.1754944e-38, %v1066_v33  ;;  %v1034_v12 = vand.u32 2147483647, %v3141_v34  ;;  %v1036_v49 = vand.u32 2147483648, %v3141_v34  ;;  %vm3521_vm11 = vmor %vm985_vm6, %vm986_vm14  ;;  %v3536_v24 = vld [vmem:[#allocation4 + $0x18] sm:$0xff] }
 0x203   :  { %v1229_v44 = vmul.f32 %v3455_v52, %v1098_v22  ;;  %vm1065_vm7 = vcmp.eq.f32.partialorder %v1064_v63, 8.507059e+37  ;;  %v1048_v41 = vsel %vm3449_vm3, %v3176_v27, %v1044_v9  ;;  %v1014_v42 = vadd.f32 %v3166_v47, %v3244_v48 }
 0x204   :  { %1243 = vmatpush.msrb.mxu2 %v1230_v7  ;;  %v1068_v2 = vsel %vm1065_vm7, %v1067_v18, %v1063_v51  ;;  %v1052_v45 = vor.u32 1.1754944e-38, %v1051_v23  ;;  %v1019_v40 = vand.u32 2147483647, %v3137_v29  ;;  %v1021_v39 = vand.u32 2147483648, %v3137_v29  ;;  %v3543_v7 = vld [vmem:[#allocation4 + $0x8] sm:$0xff] }
 0x205   :  { %v1228_v27 = vmul.f32 %v3473_v32, %v1083_v6  ;;  %vm1050_vm5 = vcmp.eq.f32.partialorder %v1049_v57, 8.507059e+37  ;;  %v1033_v48 = vsel %vm3467_vm4, %v3171_v38, %v1029_v59  ;;  %v999_v34 = vadd.f32 %v3161_v25, %v3247_v56  ;;  %v3491_v38 = vld [vmem:[#allocation4 + $0x30] sm:$0xff]  ;;  %337 = vmatmul.f32.gmra.mxu0 %v205_v5  ;;  %v206_v57 = vld [vmem:[#allocation7 + $0x118] sm:$0xff]  ;;  %v3546_v59 = vld [vmem:[#allocation4] sm:$0xff] }
 0x206   :  { %1244 = vmatpush.msrb.mxu2 %v1229_v44  ;;  %v1053_v55 = vsel %vm1050_vm5, %v1052_v45, %v1048_v41  ;;  %v1037_v16 = vor.u32 1.1754944e-38, %v1036_v49  ;;  %v1004_v35 = vand.u32 2147483647, %v3135_v53  ;;  %v1006_v58 = vand.u32 2147483648, %v3135_v53  ;;  %v1205_v6 = vld [vmem:[#allocation10] sm:$0xff]  ;;  %v1206_v18 = vld [vmem:[#allocation10 + $0x8] sm:$0xff] }
 0x207   :  { %v1227_v56 = vmul.f32 %v3491_v38, %v1068_v2  ;;  %vm1035_vm9 = vcmp.eq.f32.partialorder %v1034_v12, 8.507059e+37  ;;  %v1018_v13 = vsel %vm3485_vm8, %v3166_v47, %v1014_v42  ;;  %v984_v29 = vadd.f32 %v3139_v15, %v3238_v62  ;;  %v3509_v47 = vld [vmem:[#allocation4 + $0x28] sm:$0xff]  ;;  %v1208_v12 = vld [vmem:[#allocation10 + $0x18] sm:$0xff]  ;;  %v1209_v49 = vld [vmem:[#allocation10 + $0x20] sm:$0xff] }
 0x208   :  { %1245 = vmatpush.msrb.mxu2 %v1228_v27  ;;  %v1038_v19 = vsel %vm1035_vm9, %v1037_v16, %v1033_v48  ;;  %v1022_v28 = vor.u32 1.1754944e-38, %v1021_v39  ;;  %v989_v1 = vand.u32 2147483647, %v3126_v46  ;;  %v991_v11 = vand.u32 2147483648, %v3126_v46  ;;  %v1210_v44 = vld [vmem:[#allocation10 + $0x28] sm:$0xff]  ;;  %v1211_v41 = vld [vmem:[#allocation10 + $0x30] sm:$0xff] }
 0x209   :  { %v1226_v62 = vmul.f32 %v3509_v47, %v1053_v55  ;;  %vm1020_vm2 = vcmp.eq.f32.partialorder %v1019_v40, 8.507059e+37  ;;  %v1003_v17 = vsel %vm3503_vm12, %v3161_v25, %v999_v34  ;;  %v969_v53 = vadd.f32 %v3131_v31, %v3241_v8  ;;  %v1212_v42 = vld [vmem:[#allocation10 + $0x38] sm:$0xff]  ;;  %v215_v2 = vld [vmem:[#allocation7 + $0x160] sm:$0xff]  ;;  %v1214_v40 = vld [vmem:[#allocation10 + $0x48] sm:$0xff] }
 0x20a   :  { %1246 = vmatpush.msrb.mxu2 %v1227_v56  ;;  %v1023_v3 = vsel %vm1020_vm2, %v1022_v28, %v1018_v13  ;;  %v1007_v21 = vor.u32 1.1754944e-38, %v1006_v58  ;;  %vm970_vm13 = vweird.f32 %v3118_v37  ;;  %v976_v33 = vand.u32 2147483648, %v3118_v37  ;;  %367 = vmatmul.f32.vlgmr.msra.gmra.mxu3 %v215_v2  ;;  %v1213_v45 = vld [vmem:[#allocation10 + $0x40] sm:$0xff]  ;;  %v217_v39 = vld [vmem:[#allocation7 + $0x170] sm:$0xff]  ;;  %v218_v48 = vld [vmem:[#allocation7 + $0x178] sm:$0xff] }
 0x20b   :  { %v1225_v25 = vmul.f32 %v3527_v60, %v1038_v19  ;;  %vm1005_vm15 = vcmp.eq.f32.partialorder %v1004_v35, 8.507059e+37  ;;  %v988_v8 = vsel %vm3521_vm11, %v3139_v15, %v984_v29  ;;  %v974_v46 = vand.u32 2147483647, %v3118_v37  ;;  %vm972_vm14 = vmor %vm970_vm13, %vm971_vm0  ;;  %v3540_v15 = vld [vmem:[#allocation4 + $0x10] sm:$0xff]  ;;  %v1216_v34 = vld [vmem:[#allocation10 + $0x58] sm:$0xff] }
 0x20c   :  { %1247 = vmatpush.msrb.mxu2 %v1226_v62  ;;  %v1008_v14 = vsel %vm1005_vm15, %v1007_v21, %v1003_v17  ;;  %v992_v20 = vor.u32 1.1754944e-38, %v991_v11  ;;  %v1224_v9 = vmul.f32 %v3536_v24, %v1023_v3  ;;  %vm990_vm1 = vcmp.eq.f32.partialorder %v989_v1, 8.507059e+37  ;;  %v1215_v27 = vld [vmem:[#allocation10 + $0x50] sm:$0xff]  ;;  %v3554_v16 = vld [vmem:[%s3984_s4] ss:$0 sm:$0xff]  ;;  %v1218_v28 = vld [vmem:[#allocation10 + $0x68] sm:$0xff] }
 0x20d   :  { %v973_v22 = vsel %vm972_vm14, %v3131_v31, %v969_v53  ;;  %v977_v61 = vor.u32 1.1754944e-38, %v976_v33  ;;  %v1223_v37 = vmul.f32 %v3540_v15, %v1008_v14  ;;  %vm975_vm10 = vcmp.eq.f32.partialorder %v974_v46, 8.507059e+37  ;;  %340 = vmatmul.f32.gmra.mxu0 %v206_v57  ;;  %v1217_v5 = vld [vmem:[#allocation10 + $0x60] sm:$0xff]  ;;  %v4056_v11 = vld [vmem:[#allocation36_spill] sm:$0xff]  ;;  %v1219_v3 = vld [vmem:[#allocation10 + $0x70] sm:$0xff] }
 0x20e   :  { %1248 = vmatpush.msrb.mxu2 %v1225_v25  ;;  %v993_v10 = vsel %vm990_vm1, %v992_v20, %v988_v8  ;;  %v525_v55 = vadd.f32 %v3060_v0, %v3046_v50  ;;  %v526_v35 = vadd.f32 %v4052_v36, %v3050_v54  ;;  %v4053_v0 = vld [vmem:[#allocation28_spill] sm:$0xff]  ;;  %v4055_v54 = vld [vmem:[#allocation30_spill] sm:$0xff] }
 0x20f   :  { %v978_v23 = vsel %vm975_vm10, %v977_v61, %v973_v22  ;;  %v1222_v51 = vmul.f32 %v3543_v7, %v993_v10  ;;  %v527_v1 = vadd.f32 %v4054_v4, %v4053_v0  ;;  %v528_v62 = vadd.f32 %v4056_v11, %v4055_v54  ;;  %v1220_v20 = vld [vmem:[#allocation10 + $0x78] sm:$0xff]  ;;  %v4057_v61 = vld [vmem:[#allocation31_spill] sm:$0xff]  ;;  %v4058_v57 = vld [vmem:[#allocation38_spill] sm:$0xff] }
 0x210   :  { %1249 = vmatpush.msrb.mxu2 %v1224_v9  ;;  %v1221_v31 = vmul.f32 %v3546_v59, %v978_v23  ;;  %v545_v56 = vadd.f32 %v3554_v16, %v525_v55  ;;  %v546_v13 = vadd.f32 %v3554_v16, %v526_v35  ;;  %v4059_v23 = vld [vmem:[#allocation33_spill] sm:$0xff]  ;;  %v4061_v0 = vld [vmem:[#allocation35_spill] sm:$0xff]  ;;  %v4062_v4 = vld [vmem:[#allocation42_spill] sm:$0xff] }
 0x211   :  { %v547_v21 = vadd.f32 %v3554_v16, %v527_v1  ;;  %v548_v33 = vadd.f32 %v3554_v16, %v528_v62  ;;  %v3604_v55 = vld [vmem:[%s3986_s6] ss:$0 sm:$0xff]  ;;  %v531_v1 = vadd.f32 %v4062_v4, %v4061_v0 }
 0x212   :  { %1250 = vmatpush.msrb.mxu2 %v1223_v37  ;;  %370 = vmatmul.f32.gmra.mxu3 %v216_v43  ;;  %v2100_v29 = vmul.f32 -1.442695, %v545_v56  ;;  %v2101_v19 = vmul.f32 -1.442695, %v546_v13  ;;  %v529_v37 = vadd.f32 %v4058_v57, %v4057_v61  ;;  %v4063_v62 = vld [vmem:[#allocation37_spill] sm:$0xff] }
 0x213   :  { %v2102_v46 = vmul.f32 -1.442695, %v547_v21  ;;  %v2103_v14 = vmul.f32 -1.442695, %v548_v33 }
 0x214   :  { %1251 = vmatpush.msrb.mxu2 %v1222_v51  ;;  %2515 = vpow2.f32 %v2100_v29  ;;  %v4060_v51 = vld [vmem:[#allocation40_spill] sm:$0xff] }
 0x215   :  { %2517 = vpow2.f32 %v2101_v19 }
 0x216   :  { %1252 = vmatpush.msrb.mxu2 %v1221_v31  ;;  %v530_v31 = vadd.f32 %v4060_v51, %v4059_v23  ;;  %v551_v51 = vadd.f32 %v3554_v16, %v531_v1 }
 0x217   :  { %1253 = vmatmul.f32.vlgmr.msrb.gmra.mxu2 %v1205_v6 }
 0x21a   :  { %373 = vmatmul.f32.gmra.mxu3 %v217_v39  ;;  %v2516_v17 = vpop.eup %2515 }
 0x21b   :  { %v2518_v53 = vpop.eup %2517  ;;  %v3569_v63 = vadd.f32 1.0, %v2516_v17  ;;  %v4064_v17 = vld [vmem:[#allocation44_spill] sm:$0xff] }
 0x21c   :  { %v3574_v8 = vadd.f32 1.0, %v2518_v53  ;;  %v532_v53 = vadd.f32 %v4064_v17, %v4063_v62 }
 0x21d   :  { %2519 = vrcp.f32 %v3569_v63  ;;  %v636_v29 = vand.u32 2147483648, %v3569_v63  ;;  %vm630_vm3 = vweird.f32 %v3569_v63  ;;  %v634_v54 = vand.u32 2147483647, %v3569_v63 }
 0x21e   :  { %2521 = vrcp.f32 %v3574_v8  ;;  %v651_v11 = vand.u32 2147483648, %v3574_v8  ;;  %vm645_vm4 = vweird.f32 %v3574_v8  ;;  %v649_v21 = vand.u32 2147483647, %v3574_v8 }
 0x21f   :  { %1256 = vmatmul.f32.gmra.mxu2 %v1206_v18  ;;  %2523 = vpow2.f32 %v2102_v46  ;;  %vm635_vm8 = vcmp.eq.f32.partialorder %v634_v54, 8.507059e+37 }
 0x220   :  { %2525 = vpow2.f32 %v2103_v14  ;;  %vm650_vm9 = vcmp.eq.f32.partialorder %v649_v21, 8.507059e+37  ;;  %v4070_v21 = vld [vmem:[#allocation46_spill] sm:$0xff] }
 0x222   :  { %376 = vmatmul.f32.gmra.mxu3 %v218_v48 }
 0x223   :  { %v3578_v9 = vpop.eup %2519 }
 0x224   :  { %v3558_v58 = vpop.f32.mrf.mxu2  ;;  %v3582_v10 = vpop.eup %2521  ;;  %vm631_vm6 = vweird.f32 %v3578_v9 }
 0x225   :  { %v2524_v18 = vpop.eup %2523  ;;  %vm646_vm0 = vweird.f32 %v3582_v10  ;;  %vm3624_vm7 = vmor %vm630_vm3, %vm631_vm6 }
 0x226   :  { %vm3637_vm5 = vmor %vm645_vm4, %vm646_vm0 }
 0x227   :  { %1259 = vmatmul.f32.gmra.mxu2 %v1207_v30  ;;  %v626_v30 = vmul.f32 %v3578_v9, %v3569_v63 }
 0x229   :  { %v627_v2 = vsub.f32 1.0, %v626_v30 }
 0x22b   :  { %v628_v48 = vmul.f32 %v3578_v9, %v627_v2 }
 0x22f   :  { %1262 = vmatmul.f32.gmra.mxu2 %v1208_v12  ;;  %v2526_v12 = vpop.eup %2525 }
 0x237   :  { %1265 = vmatmul.f32.gmra.mxu2 %v1209_v49  ;;  %v641_v49 = vmul.f32 %v3582_v10, %v3574_v8 }
 0x239   :  { %v642_v43 = vsub.f32 1.0, %v641_v49 }
 0x23b   :  { %v643_v35 = vmul.f32 %v3582_v10, %v642_v43  ;;  %v2106_v43 = vmul.f32 -1.442695, %v551_v51 }
 0x23d   :  { %v644_v19 = vadd.f32 %v3582_v10, %v643_v35 }
 0x23f   :  { %1268 = vmatmul.f32.gmra.mxu2 %v1210_v44  ;;  %v549_v44 = vadd.f32 %v3554_v16, %v529_v37  ;;  %v637_v37 = vor.u32 1.1754944e-38, %v636_v29  ;;  %v648_v23 = vsel %vm3637_vm5, %v3582_v10, %v644_v19 }
 0x247   :  { %1271 = vmatmul.f32.gmra.mxu2 %v1211_v41  ;;  %v3593_v41 = vadd.f32 1.0, %v2524_v18  ;;  %v552_v18 = vadd.f32 %v3554_v16, %v532_v53 }
 0x249   :  { %2527 = vrcp.f32 %v3593_v41  ;;  %v666_v1 = vand.u32 2147483648, %v3593_v41  ;;  %vm660_vm11 = vweird.f32 %v3593_v41 }
 0x24f   :  { %1274 = vmatmul.f32.gmra.mxu2 %v1212_v42  ;;  %v550_v42 = vadd.f32 %v3554_v16, %v530_v31  ;;  %v3610_v13 = vpop.eup %2527 }
 0x250   :  { %v656_v14 = vmul.f32 %v3610_v13, %v3593_v41  ;;  %vm661_vm12 = vweird.f32 %v3610_v13 }
 0x251   :  { %v2105_v39 = vmul.f32 -1.442695, %v550_v42  ;;  %vm3678_vm13 = vmor %vm660_vm11, %vm661_vm12 }
 0x252   :  { %v657_v49 = vsub.f32 1.0, %v656_v14 }
 0x257   :  { %1277 = vmatmul.f32.gmra.mxu2 %v1213_v45  ;;  %v3596_v45 = vadd.f32 1.0, %v2526_v12 }
 0x259   :  { %2529 = vrcp.f32 %v3596_v45  ;;  %v681_v14 = vand.u32 2147483648, %v3596_v45  ;;  %vm675_vm15 = vweird.f32 %v3596_v45 }
 0x25a   :  { %v3562_v50 = vpop.f32.mrf.mxu2 }
 0x25f   :  { %1280 = vmatmul.f32.gmra.mxu2 %v1214_v40  ;;  %v2104_v40 = vmul.f32 -1.442695, %v549_v44 }
 0x261   :  { %2531 = vpow2.f32 %v2104_v40  ;;  %v2107_v40 = vmul.f32 -1.442695, %v552_v18 }
 0x262   :  { %v3572_v25 = vpop.f32.mrf.mxu2  ;;  %2533 = vpow2.f32 %v2105_v39 }
 0x267   :  { %1283 = vmatmul.f32.gmra.mxu2 %v1215_v27 }
 0x26a   :  { %v3580_v22 = vpop.f32.mrf.mxu2 }
 0x26f   :  { %1286 = vmatmul.f32.gmra.mxu2 %v1216_v34 }
 0x272   :  { %v332_v6 = vpop.f32.mrf.mxu0 }
 0x277   :  { %1289 = vmatmul.f32.gmra.mxu2 %v1217_v5  ;;  %v629_v5 = vadd.f32 %v3578_v9, %v628_v48 }
 0x279   :  { %v633_v63 = vsel %vm3624_vm7, %v3578_v9, %v629_v5  ;;  %v652_v9 = vor.u32 1.1754944e-38, %v651_v11 }
 0x27a   :  { %v335_v36 = vpop.f32.mrf.mxu0  ;;  %v638_v30 = vsel %vm635_vm8, %v637_v37, %v633_v63  ;;  %v4071_v63 = vld [vmem:[#allocation41_spill] sm:$0xff]  ;;  %v679_v37 = vand.u32 2147483647, %v3596_v45 }
 0x27b   :  { %v653_v42 = vsel %vm650_vm9, %v652_v9, %v648_v23  ;;  %v1354_v39 = vsub.f32 1.0, %v638_v30 }
 0x27c   :  { %vm680_vm10 = vcmp.eq.f32.partialorder %v679_v37, 8.507059e+37 }
 0x27d   :  { %v1370_v29 = vmul.f32 %v3546_v59, %v1354_v39 }
 0x27f   :  { %1292 = vmatmul.f32.gmra.mxu2 %v1218_v28  ;;  %v3615_v28 = vpop.eup %2529 }
 0x280   :  { %v2532_v46 = vpop.eup %2531  ;;  %v671_v8 = vmul.f32 %v3615_v28, %v3596_v45  ;;  %vm676_vm2 = vweird.f32 %v3615_v28 }
 0x281   :  { %v2534_v57 = vpop.eup %2533  ;;  %vm3691_vm14 = vmor %vm675_vm15, %vm676_vm2 }
 0x282   :  { %v338_v12 = vpop.f32.mrf.mxu0  ;;  %v3651_v44 = vadd.f32 1.0, %v2534_v57  ;;  %v672_v2 = vsub.f32 1.0, %v671_v8 }
 0x284   :  { %v673_v5 = vmul.f32 %v3615_v28, %v672_v2  ;;  %v711_v37 = vand.u32 2147483648, %v3651_v44  ;;  %vm705_vm4 = vweird.f32 %v3651_v44 }
 0x287   :  { %1295 = vmatmul.f32.gmra.mxu2 %v1219_v3  ;;  %v674_v3 = vadd.f32 %v3615_v28, %v673_v5 }
 0x28a   :  { %v341_v53 = vpop.f32.mrf.mxu0 }
 0x28f   :  { %1298 = vmatmul.f32.gmra.mxu2 %v1220_v20  ;;  %v4072_v20 = vld [vmem:[#allocation47_spill] sm:$0xff] }
 0x29a   :  { %v1254_v27 = vpop.f32.mrf.mxu2 }
 0x29b   :  { %v1302_v34 = vadd.f32 %v1254_v27, %v332_v6  ;;  %v3648_v6 = vadd.f32 1.0, %v2532_v46  ;;  %v1355_v27 = vsub.f32 1.0, %v653_v42  ;;  %v664_v46 = vand.u32 2147483647, %v3593_v41 }
 0x29d   :  { %v1322_v56 = vadd.f32 %v3604_v55, %v1302_v34  ;;  %v658_v34 = vmul.f32 %v3610_v13, %v657_v49  ;;  %v1371_v19 = vmul.f32 %v3543_v7, %v1355_v27  ;;  %v4069_v7 = vld [vmem:[#allocation39_spill] sm:$0xff]  ;;  %v678_v49 = vsel %vm3691_vm14, %v3615_v28, %v674_v3 }
 0x29e   :  { %vm665_vm1 = vcmp.eq.f32.partialorder %v664_v46, 8.507059e+37  ;;  %vm690_vm3 = vweird.f32 %v3648_v6  ;;  %v694_v8 = vand.u32 2147483647, %v3648_v6 }
 0x29f   :  { %2535 = vtanh.f32 %v1322_v56  ;;  %v659_v4 = vadd.f32 %v3610_v13, %v658_v34 }
 0x2a0   :  { %vm695_vm8 = vcmp.eq.f32.partialorder %v694_v8, 8.507059e+37 }
 0x2a1   :  { %v663_v9 = vsel %vm3678_vm13, %v3610_v13, %v659_v4 }
 0x2a2   :  { %v1257_v33 = vpop.f32.mrf.mxu2 }
 0x2a3   :  { %v1303_v61 = vadd.f32 %v1257_v33, %v335_v36  ;;  %v533_v33 = vadd.f32 %v4070_v21, %v4069_v7  ;;  %v696_v21 = vand.u32 2147483648, %v3648_v6 }
 0x2a5   :  { %v1323_v31 = vadd.f32 %v3604_v55, %v1303_v61  ;;  %v2536_v10 = vpop.eup %2535  ;;  %v534_v61 = vadd.f32 %v4072_v20, %v4071_v63  ;;  %v553_v13 = vadd.f32 %v3554_v16, %v533_v33 }
 0x2a6   :  { %v1386_v35 = vmul.f32 %v2536_v10, %v638_v30 }
 0x2a7   :  { %2537 = vtanh.f32 %v1323_v31  ;;  %v2108_v28 = vmul.f32 -1.442695, %v553_v13  ;;  %v4086_v13 = vld [vmem:[#allocation26_spill] sm:$0xff] }
 0x2a8   :  { %2539 = vrcp.f32 %v3648_v6  ;;  %v1402_v62 = vadd.f32 %v1386_v35, %v1370_v29 }
 0x2a9   :  { %2541 = vrcp.f32 %v3651_v44 }
 0x2aa   :  { %v1260_v48 = vpop.f32.mrf.mxu2  ;;  %2543 = vpow2.f32 %v2106_v43  ;;  %v554_v43 = vadd.f32 %v3554_v16, %v534_v61  ;;  %v4079_v61 = vld [vmem:[#allocation48_spill] sm:$0xff] }
 0x2ab   :  { %v1304_v36 = vadd.f32 %v1260_v48, %v338_v12  ;;  %2545 = vpow2.f32 %v2107_v40  ;;  %v667_v12 = vor.u32 1.1754944e-38, %v666_v1 }
 0x2ac   :  { %v2109_v35 = vmul.f32 -1.442695, %v554_v43  ;;  %v697_v43 = vor.u32 1.1754944e-38, %v696_v21 }
 0x2ad   :  { %v2538_v56 = vpop.eup %2537  ;;  %v1324_v54 = vadd.f32 %v3604_v55, %v1304_v36  ;;  %v668_v40 = vsel %vm665_vm1, %v667_v12, %v663_v9 }
 0x2ae   :  { %v1387_v0 = vmul.f32 %v2538_v56, %v653_v42  ;;  %v3663_v11 = vpop.eup %2539  ;;  %v682_v42 = vor.u32 1.1754944e-38, %v681_v14  ;;  %v1356_v5 = vsub.f32 1.0, %v668_v40 }
 0x2af   :  { %v3667_v59 = vpop.eup %2541  ;;  %v686_v41 = vmul.f32 %v3663_v11, %v3648_v6  ;;  %2547 = vtanh.f32 %v1324_v54  ;;  %vm691_vm6 = vweird.f32 %v3663_v11 }
 0x2b0   :  { %v1403_v17 = vadd.f32 %v1387_v0, %v1371_v19  ;;  %v2544_v51 = vpop.eup %2543  ;;  %v701_v45 = vmul.f32 %v3667_v59, %v3651_v44  ;;  %v683_v48 = vsel %vm680_vm10, %v682_v42, %v678_v49  ;;  %v4077_v0 = vld [vmem:[#allocation25_spill] sm:$0xff]  ;;  %vm706_vm0 = vweird.f32 %v3667_v59  ;;  %vm3733_vm7 = vmor %vm690_vm3, %vm691_vm6 }
 0x2b1   :  { %v2546_v30 = vpop.eup %2545  ;;  %v3702_v10 = vadd.f32 1.0, %v2544_v51  ;;  %v687_v39 = vsub.f32 1.0, %v686_v41  ;;  %v1357_v56 = vsub.f32 1.0, %v683_v48  ;;  %v4081_v51 = vld [vmem:[#allocation49_spill] sm:$0xff]  ;;  %vm3746_vm5 = vmor %vm705_vm4, %vm706_vm0 }
 0x2b2   :  { %v2295_v57 = vpack.c.bf16 %v1403_v17, %v1402_v62  ;;  %v1263_v23 = vpop.f32.mrf.mxu2  ;;  %v3705_v27 = vadd.f32 1.0, %v2546_v30  ;;  %v702_v34 = vsub.f32 1.0, %v701_v45  ;;  %v1372_v17 = vmul.f32 %v3540_v15, %v1356_v5 }
 0x2b3   :  { %v1305_v18 = vadd.f32 %v1263_v23, %v341_v53  ;;  %v688_v19 = vmul.f32 %v3663_v11, %v687_v39  ;;  %v1373_v53 = vmul.f32 %v3536_v24, %v1357_v56  ;;  %v4078_v24 = vld [vmem:[#allocation43_spill] sm:$0xff]  ;;  %v4080_v23 = vld [vmem:[#allocation45_spill] sm:$0xff]  ;;  %v712_v39 = vor.u32 1.1754944e-38, %v711_v37 }
 0x2b4   :  { %2296 = vst [vmem:[#allocation3 + $0x30] sm:$0xff] %v2295_v57   ;;  %v703_v54 = vmul.f32 %v3667_v59, %v702_v34  ;;  %v535_v57 = vadd.f32 %v4079_v61, %v4078_v24  ;;  %v536_v41 = vadd.f32 %v4081_v51, %v4080_v23  ;;  %v726_v24 = vand.u32 2147483648, %v3702_v10 }
 0x2b5   :  { %v1325_v2 = vadd.f32 %v3604_v55, %v1305_v18  ;;  %v2548_v36 = vpop.eup %2547  ;;  %v689_v7 = vadd.f32 %v3663_v11, %v688_v19  ;;  %v709_v18 = vand.u32 2147483647, %v3651_v44  ;;  %vm720_vm11 = vweird.f32 %v3702_v10 }
 0x2b6   :  { %v1388_v1 = vmul.f32 %v2548_v36, %v668_v40  ;;  %v704_v20 = vadd.f32 %v3667_v59, %v703_v54  ;;  %v556_v36 = vadd.f32 %v3554_v16, %v536_v41  ;;  %v741_v51 = vand.u32 2147483648, %v3705_v27 }
 0x2b7   :  { %2549 = vtanh.f32 %v1325_v2  ;;  %v693_v12 = vsel %vm3733_vm7, %v3663_v11, %v689_v7  ;;  %v555_v11 = vadd.f32 %v3554_v16, %v535_v57  ;;  %vm710_vm9 = vcmp.eq.f32.partialorder %v709_v18, 8.507059e+37 }
 0x2b8   :  { %2551 = vrcp.f32 %v3702_v10  ;;  %v1404_v14 = vadd.f32 %v1388_v1, %v1372_v17  ;;  %v708_v40 = vsel %vm3746_vm5, %v3667_v59, %v704_v20  ;;  %v4087_v17 = vld [vmem:[#allocation27_spill] sm:$0xff]  ;;  %vm735_vm15 = vweird.f32 %v3705_v27 }
 0x2b9   :  { %2553 = vrcp.f32 %v3705_v27  ;;  %v713_v56 = vsel %vm710_vm9, %v712_v39, %v708_v40  ;;  %v2110_v59 = vmul.f32 -1.442695, %v555_v11  ;;  %v739_v31 = vand.u32 2147483647, %v3705_v27  ;;  %v4094_v39 = vld [vmem:[#allocation51_spill] sm:$0xff] }
 0x2ba   :  { %v1266_v29 = vpop.f32.mrf.mxu2  ;;  %2555 = vpow2.f32 %v2108_v28  ;;  %v698_v28 = vsel %vm695_vm8, %v697_v43, %v693_v12  ;;  %v1359_v1 = vsub.f32 1.0, %v713_v56  ;;  %v4092_v12 = vld [vmem:[#allocation29_spill] sm:$0xff]  ;;  %v742_v43 = vor.u32 1.1754944e-38, %v741_v51 }
 0x2bb   :  { %v1306_v4 = vadd.f32 %v1266_v29, %v4077_v0  ;;  %2557 = vpow2.f32 %v2109_v35  ;;  %v2111_v0 = vmul.f32 -1.442695, %v556_v36  ;;  %vm740_vm10 = vcmp.eq.f32.partialorder %v739_v31, 8.507059e+37 }
 0x2bd   :  { %v2550_v62 = vpop.eup %2549  ;;  %v1326_v33 = vadd.f32 %v3604_v55, %v1306_v4  ;;  %v1358_v4 = vsub.f32 1.0, %v698_v28 }
 0x2be   :  { %v1389_v3 = vmul.f32 %v2550_v62, %v683_v48  ;;  %v3718_v46 = vpop.eup %2551 }
 0x2bf   :  { %v3722_v15 = vpop.eup %2553  ;;  %v716_v6 = vmul.f32 %v3718_v46, %v3702_v10  ;;  %2559 = vtanh.f32 %v1326_v33  ;;  %v1374_v33 = vmul.f32 %v3527_v60, %v1358_v4  ;;  %vm721_vm12 = vweird.f32 %v3718_v46 }
 0x2c0   :  { %v1405_v63 = vadd.f32 %v1389_v3, %v1373_v53  ;;  %v2556_v45 = vpop.eup %2555  ;;  %v731_v44 = vmul.f32 %v3722_v15, %v3705_v27  ;;  %vm736_vm2 = vweird.f32 %v3722_v15  ;;  %vm3783_vm13 = vmor %vm720_vm11, %vm721_vm12 }
 0x2c1   :  { %v2558_v2 = vpop.eup %2557  ;;  %v3758_v34 = vadd.f32 1.0, %v2556_v45  ;;  %v717_v35 = vsub.f32 1.0, %v716_v6  ;;  %vm3794_vm14 = vmor %vm735_vm15, %vm736_vm2 }
 0x2c2   :  { %v2300_v9 = vpack.c.bf16 %v1405_v63, %v1404_v14  ;;  %v1269_v30 = vpop.f32.mrf.mxu2  ;;  %v3761_v5 = vadd.f32 1.0, %v2558_v2  ;;  %v732_v29 = vsub.f32 1.0, %v731_v44  ;;  %v1375_v14 = vmul.f32 %v3509_v47, %v1359_v1  ;;  %v4093_v44 = vld [vmem:[#allocation50_spill] sm:$0xff] }
 0x2c3   :  { %v1307_v42 = vadd.f32 %v1269_v30, %v4086_v13  ;;  %v718_v62 = vmul.f32 %v3718_v46, %v717_v35  ;;  %v724_v47 = vand.u32 2147483647, %v3702_v10  ;;  %vm750_vm3 = vweird.f32 %v3758_v34 }
 0x2c4   :  { %2372 = vst [vmem:[#allocation3] sm:$0xff] %v2300_v9   ;;  %v733_v7 = vmul.f32 %v3722_v15, %v732_v29  ;;  %vm765_vm4 = vweird.f32 %v3761_v5  ;;  %v769_v51 = vand.u32 2147483647, %v3761_v5 }
 0x2c5   :  { %v1327_v48 = vadd.f32 %v3604_v55, %v1307_v42  ;;  %v2560_v19 = vpop.eup %2559  ;;  %v719_v20 = vadd.f32 %v3718_v46, %v718_v62  ;;  %v727_v42 = vor.u32 1.1754944e-38, %v726_v24  ;;  %vm725_vm1 = vcmp.eq.f32.partialorder %v724_v47, 8.507059e+37 }
 0x2c6   :  { %v1390_v3 = vmul.f32 %v2560_v19, %v698_v28  ;;  %v734_v23 = vadd.f32 %v3722_v15, %v733_v7  ;;  %vm770_vm9 = vcmp.eq.f32.partialorder %v769_v51, 8.507059e+37 }
 0x2c7   :  { %2561 = vtanh.f32 %v1327_v48  ;;  %v723_v10 = vsel %vm3783_vm13, %v3718_v46, %v719_v20  ;;  %v557_v46 = vadd.f32 %v3554_v16, %v4093_v44  ;;  %v558_v48 = vadd.f32 %v3554_v16, %v4094_v39 }
 0x2c8   :  { %2563 = vrcp.f32 %v3758_v34  ;;  %v1406_v8 = vadd.f32 %v1390_v3, %v1374_v33  ;;  %v738_v2 = vsel %vm3794_vm14, %v3722_v15, %v734_v23  ;;  %v728_v36 = vsel %vm725_vm1, %v727_v42, %v723_v10 }
 0x2c9   :  { %2565 = vrcp.f32 %v3761_v5  ;;  %v2112_v19 = vmul.f32 -1.442695, %v557_v46 }
 0x2ca   :  { %v1272_v54 = vpop.f32.mrf.mxu2  ;;  %2567 = vpow2.f32 %v2110_v59  ;;  %v2113_v59 = vmul.f32 -1.442695, %v558_v48 }
 0x2cb   :  { %v1308_v53 = vadd.f32 %v1272_v54, %v4087_v17  ;;  %2569 = vpow2.f32 %v2111_v0  ;;  %v1360_v0 = vsub.f32 1.0, %v728_v36 }
 0x2cd   :  { %v2562_v21 = vpop.eup %2561  ;;  %v1328_v61 = vadd.f32 %v3604_v55, %v1308_v53  ;;  %v1376_v7 = vmul.f32 %v3491_v38, %v1360_v0 }
 0x2ce   :  { %v1391_v63 = vmul.f32 %v2562_v21, %v713_v56  ;;  %v3774_v57 = vpop.eup %2563  ;;  %v743_v56 = vsel %vm740_vm10, %v742_v43, %v738_v2 }
 0x2cf   :  { %v3778_v60 = vpop.eup %2565  ;;  %v746_v45 = vmul.f32 %v3774_v57, %v3758_v34  ;;  %2571 = vtanh.f32 %v1328_v61  ;;  %v1361_v4 = vsub.f32 1.0, %v743_v56  ;;  %vm751_vm6 = vweird.f32 %v3774_v57 }
 0x2d0   :  { %v1407_v37 = vadd.f32 %v1391_v63, %v1375_v14  ;;  %v2568_v30 = vpop.eup %2567  ;;  %v761_v27 = vmul.f32 %v3778_v60, %v3761_v5  ;;  %v756_v63 = vand.u32 2147483648, %v3758_v34  ;;  %vm766_vm0 = vweird.f32 %v3778_v60  ;;  %vm3833_vm7 = vmor %vm750_vm3, %vm751_vm6 }
 0x2d1   :  { %v2570_v13 = vpop.eup %2569  ;;  %v3807_v11 = vadd.f32 1.0, %v2568_v30  ;;  %v747_v28 = vsub.f32 1.0, %v746_v45  ;;  %v1377_v21 = vmul.f32 %v3473_v32, %v1361_v4  ;;  %v754_v32 = vand.u32 2147483647, %v3758_v34  ;;  %vm3844_vm5 = vmor %vm765_vm4, %vm766_vm0 }
 0x2d2   :  { %v2305_v41 = vpack.c.bf16 %v1407_v37, %v1406_v8  ;;  %v1275_v18 = vpop.f32.mrf.mxu2  ;;  %v3811_v35 = vadd.f32 1.0, %v2570_v13  ;;  %v762_v15 = vsub.f32 1.0, %v761_v27  ;;  %v771_v37 = vand.u32 2147483648, %v3761_v5 }
 0x2d3   :  { %v1309_v49 = vadd.f32 %v1275_v18, %v4092_v12  ;;  %v748_v54 = vmul.f32 %v3774_v57, %v747_v28  ;;  %v757_v10 = vor.u32 1.1754944e-38, %v756_v63  ;;  %v4099_v12 = vld [vmem:[#allocation52_spill] sm:$0xff]  ;;  %vm755_vm8 = vcmp.eq.f32.partialorder %v754_v32, 8.507059e+37 }
 0x2d4   :  { %2373 = vst [vmem:[#allocation3 + $0x18] sm:$0xff] %v2305_v41   ;;  %v763_v53 = vmul.f32 %v3778_v60, %v762_v15  ;;  %vm780_vm11 = vweird.f32 %v3807_v11  ;;  %vm795_vm15 = vweird.f32 %v3811_v35  ;;  %v799_v63 = vand.u32 2147483647, %v3811_v35 }
 0x2d5   :  { %v1329_v40 = vadd.f32 %v3604_v55, %v1309_v49  ;;  %v2572_v29 = vpop.eup %2571  ;;  %v749_v14 = vadd.f32 %v3774_v57, %v748_v54  ;;  %v772_v49 = vor.u32 1.1754944e-38, %v771_v37 }
 0x2d6   :  { %v1392_v17 = vmul.f32 %v2572_v29, %v728_v36  ;;  %v764_v8 = vadd.f32 %v3778_v60, %v763_v53  ;;  %vm800_vm10 = vcmp.eq.f32.partialorder %v799_v63, 8.507059e+37 }
 0x2d7   :  { %2573 = vtanh.f32 %v1329_v40  ;;  %v753_v34 = vsel %vm3833_vm7, %v3774_v57, %v749_v14  ;;  %v559_v57 = vadd.f32 %v3554_v16, %v4099_v12 }
 0x2d8   :  { %2575 = vrcp.f32 %v3807_v11  ;;  %v1408_v24 = vadd.f32 %v1392_v17, %v1376_v7  ;;  %v768_v6 = vsel %vm3844_vm5, %v3778_v60, %v764_v8  ;;  %v758_v2 = vsel %vm755_vm8, %v757_v10, %v753_v34 }
 0x2d9   :  { %2577 = vrcp.f32 %v3811_v35  ;;  %v773_v43 = vsel %vm770_vm9, %v772_v49, %v768_v6  ;;  %v2114_v39 = vmul.f32 -1.442695, %v559_v57  ;;  %v1362_v36 = vsub.f32 1.0, %v758_v2 }
 0x2da   :  { %v1278_v1 = vpop.f32.mrf.mxu2  ;;  %2579 = vpow2.f32 %v2112_v19  ;;  %v1363_v28 = vsub.f32 1.0, %v773_v43 }
 0x2db   :  { %v1310_v62 = vadd.f32 %v1278_v1, %v3558_v58  ;;  %2581 = vpow2.f32 %v2113_v59  ;;  %v1378_v0 = vmul.f32 %v3455_v52, %v1362_v36 }
 0x2dc   :  { %v1379_v4 = vmul.f32 %v3435_v26, %v1363_v28  ;;  %v784_v26 = vand.u32 2147483647, %v3807_v11 }
 0x2dd   :  { %v2574_v3 = vpop.eup %2573  ;;  %v1330_v20 = vadd.f32 %v3604_v55, %v1310_v62  ;;  %v786_v62 = vand.u32 2147483648, %v3807_v11 }
 0x2de   :  { %v1393_v33 = vmul.f32 %v2574_v3, %v743_v56  ;;  %v3824_v58 = vpop.eup %2575  ;;  %vm785_vm1 = vcmp.eq.f32.partialorder %v784_v26, 8.507059e+37 }
 0x2df   :  { %v3828_v38 = vpop.eup %2577  ;;  %v776_v31 = vmul.f32 %v3824_v58, %v3807_v11  ;;  %2583 = vtanh.f32 %v1330_v20  ;;  %vm781_vm12 = vweird.f32 %v3824_v58  ;;  %v787_v47 = vor.u32 1.1754944e-38, %v786_v62 }
 0x2e0   :  { %v1409_v61 = vadd.f32 %v1393_v33, %v1377_v21  ;;  %v2580_v9 = vpop.eup %2579  ;;  %v791_v5 = vmul.f32 %v3828_v38, %v3811_v35  ;;  %vm796_vm2 = vweird.f32 %v3828_v38  ;;  %v801_v21 = vand.u32 2147483648, %v3811_v35  ;;  %vm3883_vm13 = vmor %vm780_vm11, %vm781_vm12 }
 0x2e1   :  { %v2582_v45 = vpop.eup %2581  ;;  %v3857_v27 = vadd.f32 1.0, %v2580_v9  ;;  %v777_v44 = vsub.f32 1.0, %v776_v31  ;;  %vm3896_vm14 = vmor %vm795_vm15, %vm796_vm2 }
 0x2e2   :  { %v2310_v23 = vpack.c.bf16 %v1409_v61, %v1408_v24  ;;  %v1281_v41 = vpop.f32.mrf.mxu2  ;;  %v3861_v46 = vadd.f32 1.0, %v2582_v45  ;;  %v792_v60 = vsub.f32 1.0, %v791_v5  ;;  %v368_v24 = vpop.f32.mrf.mxu3 }
 0x2e3   :  { %v1311_v30 = vadd.f32 %v1281_v41, %v3562_v50  ;;  %v4100_v50 = vld [vmem:[#allocation53_spill] sm:$0xff]  ;;  %vm810_vm3 = vweird.f32 %v3857_v27 }
 0x2e4   :  { %2374 = vst [vmem:[#allocation3 + $0x10] sm:$0xff] %v2310_v23   ;;  %v560_v42 = vadd.f32 %v3554_v16, %v4100_v50  ;;  %v778_v16 = vmul.f32 %v3824_v58, %v777_v44  ;;  %v793_v19 = vmul.f32 %v3828_v38, %v792_v60  ;;  %v2628_v44 = vld [vmem:[#allocation4 + $0x58] sm:$0xff]  ;;  %vm825_vm4 = vweird.f32 %v3861_v46 }
 0x2e5   :  { %v1331_v13 = vadd.f32 %v3604_v55, %v1311_v30  ;;  %v2584_v40 = vpop.eup %2583 }
 0x2e6   :  { %v2115_v48 = vmul.f32 -1.442695, %v560_v42  ;;  %v1394_v29 = vmul.f32 %v2584_v40, %v758_v2  ;;  %v779_v54 = vadd.f32 %v3824_v58, %v778_v16  ;;  %v794_v7 = vadd.f32 %v3828_v38, %v793_v19  ;;  %v2627_v42 = vld [vmem:[#allocation4 + $0x50] sm:$0xff] }
 0x2e7   :  { %2585 = vtanh.f32 %v1331_v13 }
 0x2e8   :  { %2587 = vrcp.f32 %v3857_v27  ;;  %v1410_v53 = vadd.f32 %v1394_v29, %v1378_v0  ;;  %v783_v11 = vsel %vm3883_vm13, %v3824_v58, %v779_v54  ;;  %v798_v51 = vsel %vm3896_vm14, %v3828_v38, %v794_v7 }
 0x2e9   :  { %2589 = vrcp.f32 %v3861_v46  ;;  %v802_v58 = vor.u32 1.1754944e-38, %v801_v21  ;;  %v788_v31 = vsel %vm785_vm1, %v787_v47, %v783_v11  ;;  %v831_v29 = vand.u32 2147483648, %v3861_v46  ;;  %v2630_v47 = vld [vmem:[#allocation4 + $0x68] sm:$0xff] }
 0x2ea   :  { %v1284_v56 = vpop.f32.mrf.mxu2  ;;  %2591 = vpow2.f32 %v2114_v39  ;;  %v1364_v5 = vsub.f32 1.0, %v788_v31  ;;  %v371_v49 = vpop.f32.mrf.mxu3  ;;  %v814_v0 = vand.u32 2147483647, %v3857_v27 }
 0x2eb   :  { %v1312_v15 = vadd.f32 %v1284_v56, %v3572_v25  ;;  %2593 = vpow2.f32 %v2115_v48  ;;  %v803_v18 = vsel %vm800_vm10, %v802_v58, %v798_v51  ;;  %v832_v7 = vor.u32 1.1754944e-38, %v831_v29  ;;  %v2632_v29 = vld [vmem:[#allocation4 + $0x78] sm:$0xff] }
 0x2ec   :  { %v1365_v10 = vsub.f32 1.0, %v803_v18  ;;  %v1380_v2 = vmul.f32 %v2627_v42, %v1364_v5  ;;  %vm815_vm8 = vcmp.eq.f32.partialorder %v814_v0, 8.507059e+37 }
 0x2ed   :  { %v2586_v59 = vpop.eup %2585  ;;  %v1332_v17 = vadd.f32 %v3604_v55, %v1312_v15  ;;  %v816_v15 = vand.u32 2147483648, %v3857_v27 }
 0x2ee   :  { %v1395_v1 = vmul.f32 %v2586_v59, %v773_v43  ;;  %v3874_v25 = vpop.eup %2587  ;;  %v1381_v43 = vmul.f32 %v2628_v44, %v1365_v10 }
 0x2ef   :  { %v3878_v52 = vpop.eup %2589  ;;  %v806_v8 = vmul.f32 %v3874_v25, %v3857_v27  ;;  %2595 = vtanh.f32 %v1332_v17  ;;  %vm811_vm6 = vweird.f32 %v3874_v25 }
 0x2f0   :  { %v1411_v3 = vadd.f32 %v1395_v1, %v1379_v4  ;;  %v2592_v61 = vpop.eup %2591  ;;  %v821_v23 = vmul.f32 %v3878_v52, %v3861_v46  ;;  %vm826_vm0 = vweird.f32 %v3878_v52  ;;  %vm3927_vm7 = vmor %vm810_vm3, %vm811_vm6  ;;  %v829_v4 = vand.u32 2147483647, %v3861_v46 }
 0x2f1   :  { %v2594_v35 = vpop.eup %2593  ;;  %v3907_v9 = vadd.f32 1.0, %v2592_v61  ;;  %v807_v34 = vsub.f32 1.0, %v806_v8  ;;  %vm827_vm5 = vmor %vm825_vm4, %vm826_vm0 }
 0x2f2   :  { %v2315_v33 = vpack.c.bf16 %v1411_v3, %v1410_v53  ;;  %v1287_v20 = vpop.f32.mrf.mxu2  ;;  %v822_v30 = vsub.f32 1.0, %v821_v23  ;;  %v817_v3 = vor.u32 1.1754944e-38, %v816_v15  ;;  %vm830_vm9 = vcmp.eq.f32.partialorder %v829_v4, 8.507059e+37  ;;  %v374_v26 = vpop.f32.mrf.mxu3 }
 0x2f3   :  { %v1313_v37 = vadd.f32 %v1287_v20, %v3580_v22  ;;  %v3909_v22 = vadd.f32 1.0, %v2594_v35  ;;  %v808_v6 = vmul.f32 %v3874_v25, %v807_v34  ;;  %v2629_v35 = vld [vmem:[#allocation4 + $0x60] sm:$0xff]  ;;  %vm840_vm11 = vweird.f32 %v3907_v9 }
 0x2f4   :  { %2375 = vst [vmem:[#allocation3 + $0x8] sm:$0xff] %v2315_v33   ;;  %v823_v13 = vmul.f32 %v3878_v52, %v822_v30  ;;  %v846_v5 = vand.u32 2147483648, %v3907_v9 }
 0x2f5   :  { %v1333_v41 = vadd.f32 %v3604_v55, %v1313_v37  ;;  %v2596_v45 = vpop.eup %2595  ;;  %v809_v40 = vadd.f32 %v3874_v25, %v808_v6  ;;  %v861_v10 = vand.u32 2147483648, %v3909_v22  ;;  %vm855_vm15 = vweird.f32 %v3909_v22 }
 0x2f6   :  { %v1396_v57 = vmul.f32 %v2596_v45, %v788_v31  ;;  %v824_v56 = vadd.f32 %v3878_v52, %v823_v13 }
 0x2f7   :  { %2597 = vtanh.f32 %v1333_v41  ;;  %v813_v53 = vsel %vm3927_vm7, %v3874_v25, %v809_v40  ;;  %v862_v44 = vor.u32 1.1754944e-38, %v861_v10 }
 0x2f8   :  { %2599 = vrcp.f32 %v3907_v9  ;;  %v1412_v36 = vadd.f32 %v1396_v57, %v1380_v2  ;;  %v828_v27 = vsel %vm827_vm5, %v3878_v52, %v824_v56  ;;  %v818_v33 = vsel %vm815_vm8, %v817_v3, %v813_v53  ;;  %v2631_v56 = vld [vmem:[#allocation4 + $0x70] sm:$0xff]  ;;  %v2269_v53 = vld [vmem:[#allocation3] sm:$0xff] }
 0x2f9   :  { %2601 = vrcp.f32 %v3909_v22  ;;  %v833_v14 = vsel %vm830_vm9, %v832_v7, %v828_v27  ;;  %v859_v57 = vand.u32 2147483647, %v3909_v22  ;;  %v847_v2 = vor.u32 1.1754944e-38, %v846_v5  ;;  %v2268_v27 = vld [vmem:[#allocation3 + $0x30] sm:$0xff]  ;;  %v2260_v3 = vld [vmem:[#allocation12] sm:$0xff]  ;;  %v2261_v7 = vld [vmem:[#allocation12 + $0x8] sm:$0xff] }
 0x2fa   :  { %v1290_v38 = vpop.f32.mrf.mxu2  ;;  %v1367_v61 = vsub.f32 1.0, %v833_v14  ;;  %v377_v30 = vpop.f32.mrf.mxu3 }
 0x2fb   :  { %v1314_v12 = vadd.f32 %v1290_v38, %v368_v24  ;;  %v1366_v24 = vsub.f32 1.0, %v818_v33  ;;  %vm860_vm10 = vcmp.eq.f32.partialorder %v859_v57, 8.507059e+37  ;;  %v2291_v57 = vld [vmem:[#allocation15 + $0x38] sm:$0xff] }
 0x2fc   :  { %v1383_v51 = vmul.f32 %v2630_v47, %v1367_v61 }
 0x2fd   :  { %v2598_v50 = vpop.eup %2597  ;;  %v1334_v39 = vadd.f32 %v3604_v55, %v1314_v12  ;;  %v1382_v23 = vmul.f32 %v2629_v35, %v1366_v24  ;;  %v844_v12 = vand.u32 2147483647, %v3907_v9 }
 0x2fe   :  { %v1397_v60 = vmul.f32 %v2598_v50, %v803_v18  ;;  %v3918_v48 = vpop.eup %2599 }
 0x2ff   :  { %v3922_v16 = vpop.eup %2601  ;;  %v836_v54 = vmul.f32 %v3918_v48, %v3907_v9  ;;  %2603 = vtanh.f32 %v1334_v39  ;;  %vm841_vm12 = vweird.f32 %v3918_v48  ;;  %vm845_vm1 = vcmp.eq.f32.partialorder %v844_v12, 8.507059e+37  ;;  %v2276_v12 = vld [vmem:[#allocation13] sm:$0xff] }
 0x300   :  { %v1413_v28 = vadd.f32 %v1397_v60, %v1381_v43  ;;  %v851_v17 = vmul.f32 %v3922_v16, %v3909_v22  ;;  %vm856_vm2 = vweird.f32 %v3922_v16  ;;  %vm3953_vm13 = vmor %vm840_vm11, %vm841_vm12 }
 0x301   :  { %v837_v21 = vsub.f32 1.0, %v836_v54  ;;  %vm857_vm14 = vmor %vm855_vm15, %vm856_vm2  ;;  %v2272_v54 = vld [vmem:[#allocation3 + $0x8] sm:$0xff] }
 0x302   :  { %v2320_v19 = vpack.c.bf16 %v1413_v28, %v1412_v36  ;;  %v1293_v1 = vpop.f32.mrf.mxu2  ;;  %v852_v63 = vsub.f32 1.0, %v851_v17  ;;  %v2270_v17 = vld [vmem:[#allocation3 + $0x18] sm:$0xff] }
 0x303   :  { %v1315_v62 = vadd.f32 %v1293_v1, %v371_v49  ;;  %v838_v25 = vmul.f32 %v3918_v48, %v837_v21  ;;  %v2264_v21 = vld [vmem:[#allocation12 + $0x20] sm:$0xff] }
 0x304   :  { %2376 = vst [vmem:[#allocation3 + $0x20] sm:$0xff] %v2320_v19   ;;  %v853_v32 = vmul.f32 %v3922_v16, %v852_v63  ;;  %v2267_v63 = vld [vmem:[#allocation12 + $0x38] sm:$0xff] }
 0x305   :  { %v1335_v46 = vadd.f32 %v3604_v55, %v1315_v62  ;;  %v2604_v20 = vpop.eup %2603  ;;  %v839_v41 = vadd.f32 %v3918_v48, %v838_v25  ;;  %v2271_v62 = vld [vmem:[#allocation3 + $0x10] sm:$0xff] }
 0x306   :  { %v1398_v52 = vmul.f32 %v2604_v20, %v818_v33  ;;  %v854_v45 = vadd.f32 %v3922_v16, %v853_v32  ;;  %v2265_v33 = vld [vmem:[#allocation12 + $0x28] sm:$0xff] }
 0x307   :  { %2605 = vtanh.f32 %v1335_v46  ;;  %v843_v50 = vsel %vm3953_vm13, %v3918_v48, %v839_v41  ;;  %v2262_v46 = vld [vmem:[#allocation12 + $0x10] sm:$0xff] }
 0x308   :  { %v1414_v34 = vadd.f32 %v1398_v52, %v1382_v23  ;;  %v858_v42 = vsel %vm857_vm14, %v3922_v16, %v854_v45  ;;  %v848_v9 = vsel %vm845_vm1, %v847_v2, %v843_v50  ;;  %v2278_v50 = vld [vmem:[#allocation13 + $0x10] sm:$0xff]  ;;  %v2279_v2 = vld [vmem:[#allocation13 + $0x18] sm:$0xff] }
 0x309   :  { %v863_v60 = vsel %vm860_vm10, %v862_v44, %v858_v42  ;;  %v1368_v40 = vsub.f32 1.0, %v848_v9  ;;  %v2289_v42 = vld [vmem:[#allocation15 + $0x28] sm:$0xff]  ;;  %v2288_v44 = vld [vmem:[#allocation15 + $0x20] sm:$0xff] }
 0x30a   :  { %v1296_v8 = vpop.f32.mrf.mxu2  ;;  %v1369_v39 = vsub.f32 1.0, %v863_v60 }
 0x30b   :  { %v1316_v11 = vadd.f32 %v1296_v8, %v374_v26  ;;  %v1384_v15 = vmul.f32 %v2631_v56, %v1368_v40  ;;  %v2273_v1 = vld [vmem:[#allocation3 + $0x20] sm:$0xff]  ;;  %v2263_v26 = vld [vmem:[#allocation12 + $0x18] sm:$0xff]  ;;  %v2282_v40 = vld [vmem:[#allocation13 + $0x30] sm:$0xff] }
 0x30c   :  { %v1385_v48 = vmul.f32 %v2632_v29, %v1369_v39  ;;  %v2285_v39 = vld [vmem:[#allocation15 + $0x8] sm:$0xff] }
 0x30d   :  { %v2606_v37 = vpop.eup %2605  ;;  %v1336_v31 = vadd.f32 %v3604_v55, %v1316_v11 }
 0x30e   :  { %v1399_v58 = vmul.f32 %v2606_v37, %v833_v14  ;;  %v2266_v14 = vld [vmem:[#allocation12 + $0x30] sm:$0xff] }
 0x30f   :  { %2607 = vtanh.f32 %v1336_v31 }
 0x310   :  { %v1415_v18 = vadd.f32 %v1399_v58, %v1383_v51 }
 0x312   :  { %v2325_v38 = vpack.c.bf16 %v1415_v18, %v1414_v34  ;;  %v1299_v49 = vpop.f32.mrf.mxu2 }
 0x313   :  { %v1317_v13 = vadd.f32 %v1299_v49, %v377_v30  ;;  %v2277_v49 = vld [vmem:[#allocation13 + $0x8] sm:$0xff] }
 0x314   :  { %2377 = vst [vmem:[#allocation3 + $0x28] sm:$0xff] %v2325_v38  }
 0x315   :  { %v1337_v43 = vadd.f32 %v3604_v55, %v1317_v13  ;;  %v2608_v22 = vpop.eup %2607  ;;  %v2290_v13 = vld [vmem:[#allocation15 + $0x30] sm:$0xff] }
 0x316   :  { %v1400_v36 = vmul.f32 %v2608_v22, %v848_v9  ;;  %v2287_v9 = vld [vmem:[#allocation15 + $0x18] sm:$0xff]  ;;  %v2286_v22 = vld [vmem:[#allocation15 + $0x10] sm:$0xff] }
 0x317   :  { %2609 = vtanh.f32 %v1337_v43  ;;  %v2280_v43 = vld [vmem:[#allocation13 + $0x20] sm:$0xff] }
 0x318   :  { %v1416_v16 = vadd.f32 %v1400_v36, %v1384_v15  ;;  %v2283_v36 = vld [vmem:[#allocation13 + $0x38] sm:$0xff] }
 0x31b   :  { %v2274_v4 = vld [vmem:[#allocation3 + $0x28] sm:$0xff] }
 0x31d   :  { %v2610_v28 = vpop.eup %2609 }
 0x31e   :  { %v1401_v19 = vmul.f32 %v2610_v28, %v863_v60  ;;  %v2281_v60 = vld [vmem:[#allocation13 + $0x28] sm:$0xff]  ;;  %v2284_v28 = vld [vmem:[#allocation15] sm:$0xff] }
 0x320   :  { %v1417_v59 = vadd.f32 %v1401_v19, %v1385_v48 }
 0x322   :  { %v2330_v0 = vpack.c.bf16 %v1417_v59, %v1416_v16 }
 0x324   :  { %2378 = vst [vmem:[#allocation3 + $0x38] sm:$0xff] %v2330_v0  }
 0x32b   :  { %v2275_v55 = vld [vmem:[#allocation3 + $0x38] sm:$0xff] }
 0x32c   :  { %1594 = vmatpush.bf16.msrb.mxu3 %v2275_v55 }
 0x330   :  { %1595 = vmatpush.bf16.msrb.mxu3 %v2274_v4 }
 0x334   :  { %1596 = vmatpush.bf16.msrb.mxu3 %v2273_v1 }
 0x338   :  { %1597 = vmatpush.bf16.msrb.mxu3 %v2272_v54 }
 0x33c   :  { %1598 = vmatpush.bf16.msrb.mxu3 %v2271_v62 }
 0x340   :  { %1599 = vmatpush.bf16.msrb.mxu3 %v2270_v17 }
 0x344   :  { %1600 = vmatpush.bf16.msrb.mxu3 %v2269_v53 }
 0x348   :  { %1601 = vmatpush.bf16.msrb.mxu3 %v2268_v27 }
 0x34b   :  { %1602 = vmatmul.bf16.vlgmr.msrb.gmra.mxu3 %v2260_v3 }
 0x34c   :  { %1995 = vmatpush.bf16.msra.mxu3 %v2291_v57 }
 0x350   :  { %1996 = vmatpush.bf16.msra.mxu3 %v2290_v13 }
 0x354   :  { %1997 = vmatpush.bf16.msra.mxu3 %v2289_v42 }
 0x358   :  { %1998 = vmatpush.bf16.msra.mxu3 %v2288_v44 }
 0x35b   :  { %1607 = vmatmul.bf16.gmra.mxu3 %v2261_v7 }
 0x35c   :  { %1999 = vmatpush.bf16.msra.mxu3 %v2287_v9 }
 0x360   :  { %2000 = vmatpush.bf16.msra.mxu3 %v2286_v22 }
 0x364   :  { %2001 = vmatpush.bf16.msra.mxu3 %v2285_v39 }
 0x368   :  { %2002 = vmatpush.bf16.msra.mxu3 %v2284_v28 }
 0x36b   :  { %1612 = vmatmul.bf16.gmra.mxu3 %v2262_v46 }
 0x37b   :  { %1617 = vmatmul.bf16.gmra.mxu3 %v2263_v26 }
 0x38b   :  { %1622 = vmatmul.bf16.gmra.mxu3 %v2264_v21 }
 0x39b   :  { %1627 = vmatmul.bf16.gmra.mxu3 %v2265_v33 }
 0x3ab   :  { %1632 = vmatmul.bf16.gmra.mxu3 %v2266_v14 }
 0x3bb   :  { %1637 = vmatmul.bf16.gmra.mxu3 %v2267_v63 }
 0x3ce   :  { %v1603_v20 = vpop.f32.mrf.mxu3 }
 0x3d6   :  { %v1605_v24 = vpop.f32.mrf.mxu3 }
 0x3d7   :  { %v1643_v6 = vpack.c.bf16 %v1605_v24, %v1603_v20 }
 0x3de   :  { %v1608_v61 = vpop.f32.mrf.mxu3 }
 0x3e6   :  { %v1610_v8 = vpop.f32.mrf.mxu3 }
 0x3e7   :  { %v1644_v38 = vpack.c.bf16 %v1610_v8, %v1608_v61 }
 0x3ee   :  { %v1613_v25 = vpop.f32.mrf.mxu3 }
 0x3f6   :  { %v1615_v11 = vpop.f32.mrf.mxu3 }
 0x3f7   :  { %v1645_v10 = vpack.c.bf16 %v1615_v11, %v1613_v25 }
 0x3fe   :  { %v1618_v52 = vpop.f32.mrf.mxu3 }
 0x406   :  { %v1620_v32 = vpop.f32.mrf.mxu3 }
 0x407   :  { %v1646_v5 = vpack.c.bf16 %v1620_v32, %v1618_v52 }
 0x40e   :  { %v1623_v37 = vpop.f32.mrf.mxu3 }
 0x416   :  { %v1625_v35 = vpop.f32.mrf.mxu3 }
 0x417   :  { %v1647_v45 = vpack.c.bf16 %v1625_v35, %v1623_v37 }
 0x41e   :  { %v1628_v23 = vpop.f32.mrf.mxu3 }
 0x426   :  { %v1630_v47 = vpop.f32.mrf.mxu3 }
 0x427   :  { %v1648_v30 = vpack.c.bf16 %v1630_v47, %v1628_v23 }
 0x42e   :  { %v1633_v51 = vpop.f32.mrf.mxu3 }
 0x436   :  { %v1635_v58 = vpop.f32.mrf.mxu3 }
 0x437   :  { %v1649_v18 = vpack.c.bf16 %v1635_v58, %v1633_v51 }
 0x43e   :  { %v1638_v41 = vpop.f32.mrf.mxu3 }
 0x446   :  { %v1640_v31 = vpop.f32.mrf.mxu3 }
 0x447   :  { %v1650_v34 = vpack.c.bf16 %v1640_v31, %v1638_v41 }
 0x449   :  { %1731 = vmatpush.bf16.msra.mxu2 %v1650_v34 }
 0x44d   :  { %1732 = vmatpush.bf16.msra.mxu2 %v1649_v18 }
 0x451   :  { %1733 = vmatpush.bf16.msra.mxu2 %v1648_v30 }
 0x455   :  { %1734 = vmatpush.bf16.msra.mxu2 %v1647_v45 }
 0x459   :  { %1735 = vmatpush.bf16.msra.mxu2 %v1646_v5 }
 0x45d   :  { %1736 = vmatpush.bf16.msra.mxu2 %v1645_v10 }
 0x461   :  { %1737 = vmatpush.bf16.msra.mxu2 %v1644_v38 }
 0x465   :  { %1738 = vmatpush.bf16.msra.mxu2 %v1643_v6 }
 0x468   :  { %1739 = vmatmul.bf16.vlgmr.msra.gmra.mxu2 %v2276_v12 }
 0x478   :  { %1744 = vmatmul.bf16.gmra.mxu2 %v2277_v49 }
 0x488   :  { %1749 = vmatmul.bf16.gmra.mxu2 %v2278_v50 }
 0x498   :  { %1754 = vmatmul.bf16.gmra.mxu2 %v2279_v2 }
 0x4a8   :  { %1759 = vmatmul.bf16.gmra.mxu2 %v2280_v43 }
 0x4b8   :  { %1764 = vmatmul.bf16.gmra.mxu2 %v2281_v60 }
 0x4c8   :  { %1769 = vmatmul.bf16.gmra.mxu2 %v2282_v40 }
 0x4d8   :  { %1774 = vmatmul.bf16.gmra.mxu2 %v2283_v36 }
 0x4eb   :  { %v1740_v56 = vpop.f32.mrf.mxu2 }
 0x4ec   :  { %v1831_v15 = vmax.f32 %v1740_v56, 0.0 }
 0x4ee   :  { %v1847_v48 = vpack.c.bf16 %v1831_v15, %v1831_v15 }
 0x4f0   :  { %v1915_v0 = vunpack.c.l.b16 %v1847_v48 }
 0x4f3   :  { %v1742_v29 = vpop.f32.mrf.mxu2 }
 0x4f4   :  { %v1832_v19 = vmax.f32 %v1742_v29, 0.0 }
 0x4f6   :  { %v1848_v16 = vpack.c.bf16 %v1832_v19, %v1832_v19  ;;  %v2335_v59 = vpack.c.bf16 %v1832_v19, %v1831_v15 }
 0x4f8   :  { %2336 = vst [vmem:[#allocation17] sm:$0xff] %v2335_v59   ;;  %v1916_v55 = vunpack.c.l.b16 %v1848_v16 }
 0x4fa   :  { %v1931_v4 = vpack.c.b16 %v1916_v55, %v1915_v0 }
 0x4fb   :  { %v1745_v1 = vpop.f32.mrf.mxu2 }
 0x4fc   :  { %2003 = vmatmul.bf16.vlgmr.msra.gmra.mxu3 %v1931_v4  ;;  %v1833_v54 = vmax.f32 %v1745_v1, 0.0 }
 0x4fe   :  { %v1849_v17 = vpack.c.bf16 %v1833_v54, %v1833_v54 }
 0x500   :  { %v1917_v7 = vunpack.c.l.b16 %v1849_v17 }
 0x503   :  { %v1747_v62 = vpop.f32.mrf.mxu2 }
 0x504   :  { %v1834_v53 = vmax.f32 %v1747_v62, 0.0 }
 0x506   :  { %v1850_v27 = vpack.c.bf16 %v1834_v53, %v1834_v53  ;;  %v2340_v3 = vpack.c.bf16 %v1834_v53, %v1833_v54 }
 0x508   :  { %2379 = vst [vmem:[#allocation17 + $0x8] sm:$0xff] %v2340_v3   ;;  %v1918_v46 = vunpack.c.l.b16 %v1850_v27  ;;  %v2450_v3 = vld [vmem:[%s3990_s10] ss:$0 sm:$0xff]  ;;  %s2873_s10 = smov [#allocation16]  }
 0x509   :  { %s2064_s12 = sshll.u32 %s2873_s10, 4  ;;  %s2065_s12 = int_to_ptr.vmem [resolvable:$true] %s2064_s12 }
 0x50a   :  { %v1932_v26 = vpack.c.b16 %v1918_v46, %v1917_v7 }
 0x50b   :  { %v1750_v21 = vpop.f32.mrf.mxu2 }
 0x50c   :  { %2008 = vmatmul.bf16.gmra.mxu3 %v1932_v26  ;;  %v1835_v33 = vmax.f32 %v1750_v21, 0.0 }
 0x50e   :  { %v1851_v63 = vpack.c.bf16 %v1835_v33, %v1835_v33 }
 0x510   :  { %v1919_v8 = vunpack.c.l.b16 %v1851_v63 }
 0x513   :  { %v1752_v14 = vpop.f32.mrf.mxu2 }
 0x514   :  { %v1836_v20 = vmax.f32 %v1752_v14, 0.0 }
 0x516   :  { %v1852_v24 = vpack.c.bf16 %v1836_v20, %v1836_v20  ;;  %v2345_v61 = vpack.c.bf16 %v1836_v20, %v1835_v33 }
 0x518   :  { %2380 = vst [vmem:[#allocation17 + $0x10] sm:$0xff] %v2345_v61   ;;  %v1920_v25 = vunpack.c.l.b16 %v1852_v24 }
 0x51a   :  { %v1933_v11 = vpack.c.b16 %v1920_v25, %v1919_v8 }
 0x51b   :  { %v1755_v52 = vpop.f32.mrf.mxu2 }
 0x51c   :  { %2013 = vmatmul.bf16.gmra.mxu3 %v1933_v11  ;;  %v1837_v32 = vmax.f32 %v1755_v52, 0.0 }
 0x51e   :  { %v1853_v35 = vpack.c.bf16 %v1837_v32, %v1837_v32 }
 0x520   :  { %v1921_v58 = vunpack.c.l.b16 %v1853_v35 }
 0x523   :  { %v1757_v37 = vpop.f32.mrf.mxu2 }
 0x524   :  { %v1838_v23 = vmax.f32 %v1757_v37, 0.0 }
 0x526   :  { %v1854_v47 = vpack.c.bf16 %v1838_v23, %v1838_v23  ;;  %v2350_v51 = vpack.c.bf16 %v1838_v23, %v1837_v32 }
 0x528   :  { %2381 = vst [vmem:[#allocation17 + $0x18] sm:$0xff] %v2350_v51   ;;  %v1922_v41 = vunpack.c.l.b16 %v1854_v47 }
 0x52a   :  { %v1934_v31 = vpack.c.b16 %v1922_v41, %v1921_v58 }
 0x52b   :  { %v1760_v34 = vpop.f32.mrf.mxu2 }
 0x52c   :  { %2018 = vmatmul.bf16.gmra.mxu3 %v1934_v31  ;;  %v1839_v18 = vmax.f32 %v1760_v34, 0.0 }
 0x52e   :  { %v1855_v45 = vpack.c.bf16 %v1839_v18, %v1839_v18 }
 0x530   :  { %v1923_v6 = vunpack.c.l.b16 %v1855_v45 }
 0x533   :  { %v1762_v30 = vpop.f32.mrf.mxu2 }
 0x534   :  { %v1840_v5 = vmax.f32 %v1762_v30, 0.0 }
 0x536   :  { %v1856_v10 = vpack.c.bf16 %v1840_v5, %v1840_v5  ;;  %v2355_v38 = vpack.c.bf16 %v1840_v5, %v1839_v18 }
 0x538   :  { %2382 = vst [vmem:[#allocation17 + $0x20] sm:$0xff] %v2355_v38   ;;  %v1924_v12 = vunpack.c.l.b16 %v1856_v10 }
 0x53a   :  { %v1935_v57 = vpack.c.b16 %v1924_v12, %v1923_v6 }
 0x53b   :  { %v1765_v49 = vpop.f32.mrf.mxu2 }
 0x53c   :  { %2023 = vmatmul.bf16.gmra.mxu3 %v1935_v57  ;;  %v1841_v13 = vmax.f32 %v1765_v49, 0.0 }
 0x53e   :  { %v1857_v42 = vpack.c.bf16 %v1841_v13, %v1841_v13 }
 0x540   :  { %v1925_v9 = vunpack.c.l.b16 %v1857_v42 }
 0x543   :  { %v1767_v50 = vpop.f32.mrf.mxu2 }
 0x544   :  { %v1842_v2 = vmax.f32 %v1767_v50, 0.0 }
 0x546   :  { %v1858_v44 = vpack.c.bf16 %v1842_v2, %v1842_v2  ;;  %v2360_v43 = vpack.c.bf16 %v1842_v2, %v1841_v13 }
 0x548   :  { %2383 = vst [vmem:[#allocation17 + $0x28] sm:$0xff] %v2360_v43   ;;  %v1926_v60 = vunpack.c.l.b16 %v1858_v44 }
 0x54a   :  { %v1936_v22 = vpack.c.b16 %v1926_v60, %v1925_v9 }
 0x54b   :  { %v1770_v40 = vpop.f32.mrf.mxu2 }
 0x54c   :  { %2028 = vmatmul.bf16.gmra.mxu3 %v1936_v22  ;;  %v1843_v39 = vmax.f32 %v1770_v40, 0.0 }
 0x54e   :  { %v1859_v28 = vpack.c.bf16 %v1843_v39, %v1843_v39 }
 0x550   :  { %v1927_v48 = vunpack.c.l.b16 %v1859_v28 }
 0x553   :  { %v1772_v36 = vpop.f32.mrf.mxu2 }
 0x554   :  { %v1844_v56 = vmax.f32 %v1772_v36, 0.0 }
 0x556   :  { %v1860_v15 = vpack.c.bf16 %v1844_v56, %v1844_v56  ;;  %v2365_v29 = vpack.c.bf16 %v1844_v56, %v1843_v39 }
 0x558   :  { %2384 = vst [vmem:[#allocation17 + $0x30] sm:$0xff] %v2365_v29   ;;  %v1928_v19 = vunpack.c.l.b16 %v1860_v15 }
 0x55a   :  { %v1937_v16 = vpack.c.b16 %v1928_v19, %v1927_v48 }
 0x55b   :  { %v1775_v59 = vpop.f32.mrf.mxu2 }
 0x55c   :  { %2033 = vmatmul.bf16.gmra.mxu3 %v1937_v16  ;;  %v1845_v0 = vmax.f32 %v1775_v59, 0.0 }
 0x55e   :  { %v1861_v4 = vpack.c.bf16 %v1845_v0, %v1845_v0 }
 0x560   :  { %v1929_v17 = vunpack.c.l.b16 %v1861_v4 }
 0x563   :  { %v1777_v55 = vpop.f32.mrf.mxu2 }
 0x564   :  { %v1846_v1 = vmax.f32 %v1777_v55, 0.0 }
 0x566   :  { %v1862_v54 = vpack.c.bf16 %v1846_v1, %v1846_v1  ;;  %v2370_v62 = vpack.c.bf16 %v1846_v1, %v1845_v0 }
 0x568   :  { %2385 = vst [vmem:[#allocation17 + $0x38] sm:$0xff] %v2370_v62   ;;  %v1930_v53 = vunpack.c.l.b16 %v1862_v54 }
 0x569   :  { %2085 = dma.vmem_to_hbm [thread:$0]  %s2078_s25, 1024, %s2080_s0, [#allocation18], %s2866_s21, %s2866_s21, %s2867_s22  }
 0x56a   :  { %v1938_v27 = vpack.c.b16 %v1930_v53, %v1929_v17 }
 0x56c   :  { %2038 = vmatmul.bf16.gmra.mxu3 %v1938_v27 }
 0x57f   :  { %v2004_v7 = vpop.f32.mrf.mxu3 }
 0x580   :  { %v2005_v46 = vadd.f32 %v2450_v3, %v2004_v7 }
 0x582   :  { %2044 = vst [vmem:[#allocation16] sm:$0xff] %v2005_v46 }
 0x587   :  { %v2006_v26 = vpop.f32.mrf.mxu3 }
 0x588   :  { %v2007_v21 = vadd.f32 %v2450_v3, %v2006_v26 }
 0x58a   :  { %2045 = vst [vmem:[#allocation16 + $0x8] sm:$0xff] %v2007_v21 }
 0x58f   :  { %v2009_v33 = vpop.f32.mrf.mxu3 }
 0x590   :  { %v2010_v14 = vadd.f32 %v2450_v3, %v2009_v33 }
 0x592   :  { %2046 = vst [vmem:[#allocation16 + $0x10] sm:$0xff] %v2010_v14 }
 0x597   :  { %v2011_v63 = vpop.f32.mrf.mxu3 }
 0x598   :  { %v2012_v20 = vadd.f32 %v2450_v3, %v2011_v63 }
 0x59a   :  { %2047 = vst [vmem:[#allocation16 + $0x18] sm:$0xff] %v2012_v20 }
 0x59f   :  { %v2014_v24 = vpop.f32.mrf.mxu3 }
 0x5a0   :  { %v2015_v61 = vadd.f32 %v2450_v3, %v2014_v24 }
 0x5a2   :  { %2048 = vst [vmem:[#allocation16 + $0x20] sm:$0xff] %v2015_v61 }
 0x5a7   :  { %v2016_v8 = vpop.f32.mrf.mxu3 }
 0x5a8   :  { %v2017_v25 = vadd.f32 %v2450_v3, %v2016_v8 }
 0x5aa   :  { %2049 = vst [vmem:[#allocation16 + $0x28] sm:$0xff] %v2017_v25 }
 0x5af   :  { %v2019_v11 = vpop.f32.mrf.mxu3 }
 0x5b0   :  { %v2020_v52 = vadd.f32 %v2450_v3, %v2019_v11 }
 0x5b2   :  { %2050 = vst [vmem:[#allocation16 + $0x30] sm:$0xff] %v2020_v52 }
 0x5b7   :  { %v2021_v32 = vpop.f32.mrf.mxu3 }
 0x5b8   :  { %v2022_v37 = vadd.f32 %v2450_v3, %v2021_v32 }
 0x5ba   :  { %2051 = vst [vmem:[#allocation16 + $0x38] sm:$0xff] %v2022_v37 }
 0x5bf   :  { %v2024_v35 = vpop.f32.mrf.mxu3 }
 0x5c0   :  { %v2025_v23 = vadd.f32 %v2450_v3, %v2024_v35 }
 0x5c2   :  { %2052 = vst [vmem:[#allocation16 + $0x40] sm:$0xff] %v2025_v23 }
 0x5c7   :  { %v2026_v47 = vpop.f32.mrf.mxu3 }
 0x5c8   :  { %v2027_v51 = vadd.f32 %v2450_v3, %v2026_v47 }
 0x5ca   :  { %2053 = vst [vmem:[#allocation16 + $0x48] sm:$0xff] %v2027_v51 }
 0x5cf   :  { %v2029_v58 = vpop.f32.mrf.mxu3 }
 0x5d0   :  { %v2030_v41 = vadd.f32 %v2450_v3, %v2029_v58 }
 0x5d2   :  { %2054 = vst [vmem:[#allocation16 + $0x50] sm:$0xff] %v2030_v41 }
 0x5d7   :  { %v2031_v31 = vpop.f32.mrf.mxu3 }
 0x5d8   :  { %v2032_v34 = vadd.f32 %v2450_v3, %v2031_v31 }
 0x5da   :  { %2055 = vst [vmem:[#allocation16 + $0x58] sm:$0xff] %v2032_v34 }
 0x5df   :  { %v2034_v18 = vpop.f32.mrf.mxu3 }
 0x5e0   :  { %v2035_v30 = vadd.f32 %v2450_v3, %v2034_v18 }
 0x5e2   :  { %2056 = vst [vmem:[#allocation16 + $0x60] sm:$0xff] %v2035_v30 }
 0x5e7   :  { %v2036_v45 = vpop.f32.mrf.mxu3 }
 0x5e8   :  { %v2037_v5 = vadd.f32 %v2450_v3, %v2036_v45 }
 0x5ea   :  { %2057 = vst [vmem:[#allocation16 + $0x68] sm:$0xff] %v2037_v5 }
 0x5ef   :  { %v2039_v10 = vpop.f32.mrf.mxu3 }
 0x5f0   :  { %v2040_v38 = vadd.f32 %v2450_v3, %v2039_v10 }
 0x5f2   :  { %2058 = vst [vmem:[#allocation16 + $0x70] sm:$0xff] %v2040_v38 }
 0x5f7   :  { %v2041_v6 = vpop.f32.mrf.mxu3 }
 0x5f8   :  { %v2042_v12 = vadd.f32 %v2450_v3, %v2041_v6 }
 0x5fa   :  { %2059 = vst [vmem:[#allocation16 + $0x78] sm:$0xff] %v2042_v12 }
 0x5fb   :  { %2072 = dma.vmem_to_hbm [thread:$0]  %s2065_s12, 2048, %s2067_s27, [#allocation6], %s2862_s29, %s2862_s29, %s2863_s30  }
 0x5fc   :  { %2857 = dma.done.wait [#allocation6], 2048  }
 0x5fd   :  { %2858 = vsyncadd [#allocation6], 4294965248 }
 0x5fe   :  { %2859 = dma.done.wait [#allocation18], 1024  }
 0x5ff   :  { %2860 = vsyncadd [#allocation18], 4294966272 }
 0x600   :  { %2094 = vsyncpa [#allocation5], 1 }
 0x601   :  { %2095 = vsyncpa [#allocation8], 1 }
 0x602   :  { %2096 = vsyncpa [#allocation11], 1 }
 0x603   :  { %2097 = vsyncpa [#allocation14], 1 }
 0x604   :  { %2098 = vsyncpa [#allocation6], 1 }
 0x605   :  { %2099 = vsyncpa [#allocation18], 1 }

</bundles_post_ra>
